<compile_context>
chip_gen: v5e
topology: v5e:2x2
jax: 0.10.0
libtpu: 0.0.40
codegen_flags: <defaults>
</compile_context>

<pallas_src>
import functools
import math

import jax
import jax.numpy as jnp
import numpy as np
from jax.experimental import pallas as pl
from jax.experimental.pallas import tpu as pltpu

NUM_CONVS = 5


# ----------------------------------------------------------------------------
# Pallas kernel: one grid step == TB packed batch elements, full forward fused.
# ----------------------------------------------------------------------------
def encoder_kernel(
    x_ref,       # (rows, x_dim)       rows = TB * S (batch-packed)
    wl_ref,      # (x_dim, h_half)     linear.weight^T
    b0_ref,      # (1, h_half)         linear.bias + position(arange(S))  (folded)
    wth_ref,     # (h_half, 2h)        to_hidden.weight^T
    bth_ref,     # (1, 2h)
    convw_ref,   # fused:  (5, 6h, 4h)  |  split: (5, 2, 6h, 2h)   (a, g)
    convb_ref,   # fused:  (5, 1, 4h)   |  split: (5, 2, 1, 2h)
    wfh_ref,     # (2h, h_half)        from_hidden.weight^T
    bfh_ref,     # (1, h_half)
    out_ref,     # (rows, 2*h_half)    [:, :h_half]=conv_hidden, [:, h_half:]=residual
    emb_ref,     # (rows, h_half)      VMEM scratch: embedded, kept out of vregs
    *,
    seq_len,
    fused_glu,
):
    x = x_ref[...]

    # embedded = dropout(linear(x) + position_embedded); dropout == identity and
    # the position embedding is folded into b0 (same vector for every row).
    embedded = (
        jnp.dot(x, wl_ref[...], preferred_element_type=jnp.float32) + b0_ref[...]
    )
    # Stash `embedded` in VMEM scratch so it is not live (in vregs / spilled ad
    # hoc) across the 5 conv layers.
    emb_ref[...] = embedded

    # convolution_input = to_hidden(embedded)                         (rows, 2h)
    h = (
        jnp.dot(embedded, wth_ref[...], preferred_element_type=jnp.float32)
        + bth_ref[...]
    )
    rows, two_h = h.shape

    # Per-row sequence-boundary masks, hoisted out of the conv loop.  Row r is
    # sequence r // seq_len, position r % seq_len; the masks zero taps that would
    # read across the zero padding or a packed-batch boundary.
    row_pos = jax.lax.broadcasted_iota(jnp.int32, (rows, 1), 0) % seq_len
    first_mask = row_pos == 0
    last_mask = row_pos == (seq_len - 1)

    if rows % 8 == 0:
        # Sublane rotation on the XLU; wrap rows are fixed up by the masks.
        def shift_prev(v):  # result[r] = v[r-1]
            return pltpu.roll(v, 1, 0)

        def shift_next(v):  # result[r] = v[r+1]
            return pltpu.roll(v, rows - 1, 0)
    else:
        zero_row = jnp.zeros((1, two_h), h.dtype)

        def shift_prev(v):
            return jnp.concatenate([zero_row, v[: rows - 1, :]], axis=0)

        def shift_next(v):
            return jnp.concatenate([v[1:, :], zero_row], axis=0)

    # 5 residual GLU conv blocks: Conv1d(k=3, pad=1) == matmul(s) with K = 6h.
    for i in range(NUM_CONVS):
        x_m1 = jnp.where(first_mask, 0.0, shift_prev(h))   # x[s-1] (zero padded)
        x_p1 = jnp.where(last_mask, 0.0, shift_next(h))    # x[s+1] (zero padded)
        x3 = jnp.concatenate([x_m1, h, x_p1], axis=-1)      # (rows, 6h)
        if fused_glu:
            # 2h is a multiple of 128: the GLU split is lane-aligned and free.
            y = (
                jnp.dot(x3, convw_ref[i], preferred_element_type=jnp.float32)
                + convb_ref[i]
            )                                                # (rows, 4h)
            a = y[:, :two_h]
            g = y[:, two_h:]
        else:
            # 2h not lane-aligned: produce the two GLU halves with split
            # weights to avoid a cross-lane slice of the (rows, 4h) result.
            a = (
                jnp.dot(x3, convw_ref[i, 0], preferred_element_type=jnp.float32)
                + convb_ref[i, 0]
            )                                                # (rows, 2h)
            g = (
                jnp.dot(x3, convw_ref[i, 1], preferred_element_type=jnp.float32)
                + convb_ref[i, 1]
            )                                                # (rows, 2h)
        h = a * jax.nn.sigmoid(g) + h                        # GLU + residual

    # convolution_hidden = from_hidden(h)
    out_h = (
        jnp.dot(h, wfh_ref[...], preferred_element_type=jnp.float32) + bfh_ref[...]
    )

    # Single lane-dense full-block store of both outputs.
    out_ref[...] = jnp.concatenate([out_h, out_h + emb_ref[...]], axis=-1)


# ----------------------------------------------------------------------------
# Wrapper
# ----------------------------------------------------------------------------
def _pick_batch_tile(batch, seq, target_rows=512):
    """Largest divisor TB of `batch` such that the (TB*seq, .) block is legal
    (TB == batch, or TB*seq divisible by 8) and TB*seq <= target_rows."""
    divisors = [d for d in range(1, batch + 1) if batch % d == 0]
    legal = [d for d in divisors if d == batch or (d * seq) % 8 == 0]
    fitting = [d for d in legal if d * seq <= max(target_rows, seq)]
    return max(fitting) if fitting else min(legal)


def encoder_forward(x, params, sequence_length, h_dim):
    B, S, x_dim = x.shape
    assert S == sequence_length
    h_half = h_dim // 2
    two_h = 2 * h_dim
    four_h = 4 * h_dim
    six_h = 3 * two_h

    # Fold position embedding + linear bias into one (1, h_half) bias, once.
    pos_series = jnp.arange(S, dtype=jnp.float32).reshape(1, S)
    b0 = pos_series @ params["wp_t"] + params["bp"] + params["bl"]

    # Fuse the 3 conv taps along K:  (5, 3, 2h, 4h) -> (5, 6h, 4h).
    convw_fused = params["convw_t"].reshape(NUM_CONVS, six_h, four_h)
    convb = params["convb"]                                   # (5, 1, 4h)

    fused_glu = (two_h % 128 == 0)
    if fused_glu:
        convw_pack = convw_fused                              # (5, 6h, 4h)
        convb_pack = convb                                    # (5, 1, 4h)
        convw_shape = (NUM_CONVS, six_h, four_h)
        convb_shape = (NUM_CONVS, 1, four_h)
    else:
        # Pre-split into (a, g) halves so the kernel never slices across a
        # non-lane-aligned boundary.
        convw_pack = jnp.stack(
            [convw_fused[:, :, :two_h], convw_fused[:, :, two_h:]], axis=1
        )                                                     # (5, 2, 6h, 2h)
        convb_pack = jnp.stack(
            [convb[:, :, :two_h], convb[:, :, two_h:]], axis=1
        )                                                     # (5, 2, 1, 2h)
        convw_shape = (NUM_CONVS, 2, six_h, two_h)
        convb_shape = (NUM_CONVS, 2, 1, two_h)

    TB = _pick_batch_tile(B, S)
    rows = TB * S
    grid = (B // TB,)

    x2 = x.reshape(B * S, x_dim)

    full = lambda shape: pl.BlockSpec(shape, lambda b: (0,) * len(shape))

    in_specs = [
        pl.BlockSpec((rows, x_dim), lambda b: (b, 0)),
        full((x_dim, h_half)),
        full((1, h_half)),
        full((h_half, two_h)),
        full((1, two_h)),
        full(convw_shape),
        full(convb_shape),
        full((two_h, h_half)),
        full((1, h_half)),
    ]
    out_specs = pl.BlockSpec((rows, 2 * h_half), lambda b: (b, 0))
    out_shape = jax.ShapeDtypeStruct((B * S, 2 * h_half), jnp.float32)
    scratch_shapes = [pltpu.VMEM((rows, h_half), jnp.float32)]

    # --- scheduling hints ----------------------------------------------------
    f32 = 4
    weight_elems = (
        x_dim * h_half + h_half
        + h_half * two_h + two_h
        + NUM_CONVS * (six_h * four_h + four_h)
        + two_h * h_half + h_half
    )
    block_elems = rows * x_dim + rows * 2 * h_half + rows * h_half + weight_elems
    work_elems = rows * (six_h + four_h + 2 * two_h + 2 * h_half)
    vmem_limit = int(
        min(64 * 2**20, max(32 * 2**20, f32 * (2 * block_elems + 2 * work_elems)))
    )

    flops = 2 * B * S * (
        x_dim * h_half + h_half * two_h + NUM_CONVS * six_h * four_h + two_h * h_half
    )
    cost = pl.CostEstimate(
        flops=flops,
        transcendentals=B * S * two_h * NUM_CONVS,
        bytes_accessed=f32 * (B * S * x_dim + B * S * 2 * h_half + weight_elems),
    )

    out = pl.pallas_call(
        functools.partial(encoder_kernel, seq_len=S, fused_glu=fused_glu),
        grid_spec=pltpu.PrefetchScalarGridSpec(
            num_scalar_prefetch=0,
            grid=grid,
            in_specs=in_specs,
            out_specs=out_specs,
            scratch_shapes=scratch_shapes,
        ),
        out_shape=out_shape,
        compiler_params=pltpu.CompilerParams(
            dimension_semantics=("parallel",),
            vmem_limit_bytes=vmem_limit,
        ),
        cost_estimate=cost,
    )(
        x2,
        params["wl_t"],
        b0,
        params["wth_t"],
        params["bth"],
        convw_pack,
        convb_pack,
        params["wfh_t"],
        params["bfh"],
    )

    out = out.reshape(B, S, 2 * h_half)
    return out[..., :h_half], out[..., h_half:]


# ----------------------------------------------------------------------------
# Deterministic parameter init (PyTorch-style uniform(-1/sqrt(fan_in), ...))
# ----------------------------------------------------------------------------
def make_params(key, x_dim, h_dim, sequence_length):
    h_half = h_dim // 2
    two_h = 2 * h_dim
    four_h = 4 * h_dim

    keys = jax.random.split(key, 16)
    ki = iter(keys)

    def uni(k, shape, fan_in):
        bound = 1.0 / math.sqrt(fan_in)
        return jax.random.uniform(k, shape, jnp.float32, -bound, bound)

    # nn.Linear(x_dim, h_half)
    wl = uni(next(ki), (h_half, x_dim), x_dim)
    bl = uni(next(ki), (h_half,), x_dim)
    # nn.Linear(sequence_length, h_half)
    wp = uni(next(ki), (h_half, sequence_length), sequence_length)
    bp = uni(next(ki), (h_half,), sequence_length)
    # nn.Linear(h_half, 2h)
    wth = uni(next(ki), (two_h, h_half), h_half)
    bth = uni(next(ki), (two_h,), h_half)
    # nn.Linear(2h, h_half)
    wfh = uni(next(ki), (h_half, two_h), two_h)
    bfh = uni(next(ki), (h_half,), two_h)
    # 5 x Conv1d(2h -> 4h, k=3): weight (4h, 2h, 3), fan_in = 2h*3
    convw = uni(next(ki), (NUM_CONVS, four_h, two_h, 3), two_h * 3)
    convb = uni(next(ki), (NUM_CONVS, four_h), two_h * 3)

    # Pre-transpose for (row-vector @ weight) matmuls: (5, 3, 2h, 4h),
    # tap-major so a later reshape to (5, 6h, 4h) matches concat([x-1, x, x+1]).
    convw_t = jnp.transpose(convw, (0, 3, 2, 1))

    return {
        "wl_t": wl.T, "bl": bl.reshape(1, -1),
        "wp_t": wp.T, "bp": bp.reshape(1, -1),
        "wth_t": wth.T, "bth": bth.reshape(1, -1),
        "convw_t": convw_t, "convb": convb.reshape(NUM_CONVS, 1, four_h),
        "wfh_t": wfh.T, "bfh": bfh.reshape(1, -1),
    }


# ----------------------------------------------------------------------------
# Pure-JAX reference (mirrors the PyTorch forward, dropout == identity)
# ----------------------------------------------------------------------------
def encoder_ref(x, params, sequence_length):
    B, S, _ = x.shape
    pos_series = jnp.arange(S, dtype=jnp.float32).reshape(1, S)

    lin = x @ params["wl_t"] + params["bl"]                       # (B,S,h_half)
    pos = pos_series @ params["wp_t"] + params["bp"]              # (1,h_half)
    embedded = lin + pos[None, :, :]                              # (B,S,h_half)

    h = embedded @ params["wth_t"] + params["bth"]                # (B,S,2h)
    two_h = h.shape[-1]
    for i in range(NUM_CONVS):
        pad = jnp.zeros((B, 1, two_h), h.dtype)
        x_m1 = jnp.concatenate([pad, h[:, :-1, :]], axis=1)
        x_p1 = jnp.concatenate([h[:, 1:, :], pad], axis=1)
        y = (
            x_m1 @ params["convw_t"][i, 0]
            + h @ params["convw_t"][i, 1]
            + x_p1 @ params["convw_t"][i, 2]
            + params["convb"][i]
        )
        a, g = y[..., :two_h], y[..., two_h:]
        h = a * jax.nn.sigmoid(g) + h

    out_h = h @ params["wfh_t"] + params["bfh"]
    return out_h, out_h + embedded


if __name__ == "__main__":
    # Small shapes: batch=2, seq=8, x_dim=4, h_dim=32
    B, S, X_DIM, H_DIM = 2, 8, 4, 32

    key = jax.random.PRNGKey(0)
    k_param, k_x = jax.random.split(key)
    params = make_params(k_param, X_DIM, H_DIM, S)
    x = jax.random.normal(k_x, (B, S, X_DIM), dtype=jnp.float32)

    conv_hidden, residual = encoder_forward(x, params, S, H_DIM)
    jax.block_until_ready((conv_hidden, residual))

    ref_hidden, ref_residual = encoder_ref(x, params, S)
    np.testing.assert_allclose(np.asarray(conv_hidden), np.asarray(ref_hidden),
                               rtol=1e-4, atol=1e-4)
    np.testing.assert_allclose(np.asarray(residual), np.asarray(ref_residual),
                               rtol=1e-4, atol=1e-4)

    print("KERNEL_OK")
</pallas_src>

<mosaic_0001>
module attributes {stable_mosaic.version = 11 : i64} {
  func.func @encoder_kernel(%arg0: i32, %arg1: memref<16x4xf32, #tpu.memory_space<vmem>>, %arg2: memref<4x16xf32, #tpu.memory_space<vmem>>, %arg3: memref<1x16xf32, #tpu.memory_space<vmem>>, %arg4: memref<16x64xf32, #tpu.memory_space<vmem>>, %arg5: memref<1x64xf32, #tpu.memory_space<vmem>>, %arg6: memref<5x2x192x64xf32, #tpu.memory_space<vmem>>, %arg7: memref<5x2x1x64xf32, #tpu.memory_space<vmem>>, %arg8: memref<64x16xf32, #tpu.memory_space<vmem>>, %arg9: memref<1x16xf32, #tpu.memory_space<vmem>>, %arg10: memref<16x32xf32, #tpu.memory_space<vmem>>, %arg11: memref<16x16xf32, #tpu.memory_space<vmem>>) attributes {dimension_semantics = [#tpu.dimension_semantics<parallel>], iteration_bounds = array<i64: 1>, scalar_prefetch = 0 : i64, scratch_operands = 1 : i64, tpu.core_type = #tpu.core_type<tc>, window_params = [{transform_indices = @transform_0, window_bounds = array<i64: 16, 4>}, {pipeline_mode = #tpu.pipeline_mode<synchronous>, transform_indices = @transform_1, window_bounds = array<i64: 4, 16>}, {pipeline_mode = #tpu.pipeline_mode<synchronous>, transform_indices = @transform_2, window_bounds = array<i64: 1, 16>}, {pipeline_mode = #tpu.pipeline_mode<synchronous>, transform_indices = @transform_3, window_bounds = array<i64: 16, 64>}, {pipeline_mode = #tpu.pipeline_mode<synchronous>, transform_indices = @transform_4, window_bounds = array<i64: 1, 64>}, {pipeline_mode = #tpu.pipeline_mode<synchronous>, transform_indices = @transform_5, window_bounds = array<i64: 5, 2, 192, 64>}, {pipeline_mode = #tpu.pipeline_mode<synchronous>, transform_indices = @transform_6, window_bounds = array<i64: 5, 2, 1, 64>}, {pipeline_mode = #tpu.pipeline_mode<synchronous>, transform_indices = @transform_7, window_bounds = array<i64: 64, 16>}, {pipeline_mode = #tpu.pipeline_mode<synchronous>, transform_indices = @transform_8, window_bounds = array<i64: 1, 16>}, {transform_indices = @transform_9, window_bounds = array<i64: 16, 32>}]} {
    %c0 = arith.constant 0 : index
    %c0_0 = arith.constant 0 : index
    %0 = vector.load %arg1[%c0, %c0_0] : memref<16x4xf32, #tpu.memory_space<vmem>>, vector<16x4xf32>
    %c0_1 = arith.constant 0 : index
    %c0_2 = arith.constant 0 : index
    %1 = vector.load %arg2[%c0_1, %c0_2] : memref<4x16xf32, #tpu.memory_space<vmem>>, vector<4x16xf32>
    %cst = arith.constant dense<0.000000e+00> : vector<16x16xf32>
    %2 = tpu.matmul %0, %1, %cst {dimension_numbers = #tpu.dot_dimension_numbers<[1], [0], [0], [1], [0, 0, 1, 1], [], []>} : vector<16x4xf32>, vector<4x16xf32>, vector<16x16xf32> -> vector<16x16xf32>
    %c0_3 = arith.constant 0 : index
    %c0_4 = arith.constant 0 : index
    %3 = vector.load %arg3[%c0_3, %c0_4] : memref<1x16xf32, #tpu.memory_space<vmem>>, vector<1x16xf32>
    %4 = vector.broadcast %3 : vector<1x16xf32> to vector<16x16xf32>
    %5 = arith.addf %2, %4 : vector<16x16xf32>
    %c0_5 = arith.constant 0 : index
    %c0_6 = arith.constant 0 : index
    %6 = vector.load %arg11[%c0_5, %c0_6] : memref<16x16xf32, #tpu.memory_space<vmem>>, vector<16x16xf32>
    tpu.vector_store %arg11[%c0_5, %c0_6], %5 {strides = array<i32>} : memref<16x16xf32, #tpu.memory_space<vmem>>, vector<16x16xf32>,
    %c0_7 = arith.constant 0 : index
    %c0_8 = arith.constant 0 : index
    %7 = vector.load %arg4[%c0_7, %c0_8] : memref<16x64xf32, #tpu.memory_space<vmem>>, vector<16x64xf32>
    %cst_9 = arith.constant dense<0.000000e+00> : vector<16x64xf32>
    %8 = tpu.matmul %5, %7, %cst_9 {dimension_numbers = #tpu.dot_dimension_numbers<[1], [0], [0], [1], [0, 0, 1, 1], [], []>} : vector<16x16xf32>, vector<16x64xf32>, vector<16x64xf32> -> vector<16x64xf32>
    %c0_10 = arith.constant 0 : index
    %c0_11 = arith.constant 0 : index
    %9 = vector.load %arg5[%c0_10, %c0_11] : memref<1x64xf32, #tpu.memory_space<vmem>>, vector<1x64xf32>
    %10 = vector.broadcast %9 : vector<1x64xf32> to vector<16x64xf32>
    %11 = arith.addf %8, %10 : vector<16x64xf32>
    %12 = tpu.iota {dimensions = array<i32: 0>} : vector<16x1xi32>
    %c8_i32 = arith.constant 8 : i32
    %c0_i32 = arith.constant 0 : i32
    %13 = arith.cmpi eq, %c8_i32, %c0_i32 : i32
    %c1_i32 = arith.constant 1 : i32
    %14 = arith.select %13, %c1_i32, %c8_i32 : i32
    %15 = vector.broadcast %14 : i32 to vector<16x1xi32>
    %16 = arith.remsi %12, %15 : vector<16x1xi32>
    %c0_i32_12 = arith.constant 0 : i32
    %17 = vector.broadcast %c0_i32_12 : i32 to vector<16x1xi32>
    %18 = arith.cmpi ne, %16, %17 : vector<16x1xi32>
    %c0_i32_13 = arith.constant 0 : i32
    %19 = vector.broadcast %c0_i32_13 : i32 to vector<16x1xi32>
    %20 = arith.cmpi slt, %16, %19 : vector<16x1xi32>
    %c0_i32_14 = arith.constant 0 : i32
    %21 = arith.cmpi slt, %14, %c0_i32_14 : i32
    %22 = vector.broadcast %21 : i1 to vector<16x1xi1>
    %23 = vector.broadcast %22 : vector<16x1xi1> to vector<16x1xi1>
    %24 = arith.xori %20, %23 : vector<16x1xi1>
    %25 = arith.andi %24, %18 : vector<16x1xi1>
    %26 = vector.broadcast %14 : i32 to vector<16x1xi32>
    %27 = arith.addi %16, %26 : vector<16x1xi32>
    %28 = arith.select %25, %27, %16 : vector<16x1xi1>, vector<16x1xi32>
    %c0_i32_15 = arith.constant 0 : i32
    %29 = vector.broadcast %c0_i32_15 : i32 to vector<16x1xi32>
    %30 = arith.cmpi eq, %28, %29 : vector<16x1xi32>
    %c7_i32 = arith.constant 7 : i32
    %31 = vector.broadcast %c7_i32 : i32 to vector<16x1xi32>
    %32 = arith.cmpi eq, %28, %31 : vector<16x1xi32>
    %c1_i32_16 = arith.constant 1 : i32
    %33 = tpu.dynamic_rotate %11 by %c1_i32_16 dim 0 : vector<16x64xf32>, i32 -> vector<16x64xf32>
    %cst_17 = arith.constant 0.000000e+00 : f32
    %34 = vector.shape_cast %30 : vector<16x1xi1> to vector<16x1xi1>
    %35 = vector.broadcast %34 : vector<16x1xi1> to vector<16x64xi1>
    %36 = vector.broadcast %cst_17 : f32 to vector<16x64xf32>
    %37 = arith.select %35, %36, %33 : vector<16x64xi1>, vector<16x64xf32>
    %c15_i32 = arith.constant 15 : i32
    %38 = tpu.dynamic_rotate %11 by %c15_i32 dim 0 : vector<16x64xf32>, i32 -> vector<16x64xf32>
    %cst_18 = arith.constant 0.000000e+00 : f32
    %39 = vector.shape_cast %32 : vector<16x1xi1> to vector<16x1xi1>
    %40 = vector.broadcast %39 : vector<16x1xi1> to vector<16x64xi1>
    %41 = vector.broadcast %cst_18 : f32 to vector<16x64xf32>
    %42 = arith.select %40, %41, %38 : vector<16x64xi1>, vector<16x64xf32>
    %43 = tpu.concatenate %37, %11, %42 in 1 : vector<16x64xf32>, vector<16x64xf32>, vector<16x64xf32> -> vector<16x192xf32>
    %c0_19 = arith.constant 0 : index
    %c0_20 = arith.constant 0 : index
    %c0_21 = arith.constant 0 : index
    %c0_22 = arith.constant 0 : index
    %44 = vector.load %arg6[%c0_19, %c0_20, %c0_21, %c0_22] : memref<5x2x192x64xf32, #tpu.memory_space<vmem>>, vector<1x1x192x64xf32>
    %45 = vector.shape_cast %44 : vector<1x1x192x64xf32> to vector<192x64xf32>
    %cst_23 = arith.constant dense<0.000000e+00> : vector<16x64xf32>
    %46 = tpu.matmul %43, %45, %cst_23 {dimension_numbers = #tpu.dot_dimension_numbers<[1], [0], [0], [1], [0, 0, 1, 1], [], []>} : vector<16x192xf32>, vector<192x64xf32>, vector<16x64xf32> -> vector<16x64xf32>
    %c0_24 = arith.constant 0 : index
    %c0_25 = arith.constant 0 : index
    %c0_26 = arith.constant 0 : index
    %c0_27 = arith.constant 0 : index
    %47 = vector.load %arg7[%c0_24, %c0_25, %c0_26, %c0_27] : memref<5x2x1x64xf32, #tpu.memory_space<vmem>>, vector<1x1x1x64xf32>
    %48 = vector.shape_cast %47 : vector<1x1x1x64xf32> to vector<1x64xf32>
    %49 = vector.broadcast %48 : vector<1x64xf32> to vector<16x64xf32>
    %50 = arith.addf %46, %49 : vector<16x64xf32>
    %c0_28 = arith.constant 0 : index
    %c1 = arith.constant 1 : index
    %c0_29 = arith.constant 0 : index
    %c0_30 = arith.constant 0 : index
    %51 = vector.load %arg6[%c0_28, %c1, %c0_29, %c0_30] : memref<5x2x192x64xf32, #tpu.memory_space<vmem>>, vector<1x1x192x64xf32>
    %52 = vector.shape_cast %51 : vector<1x1x192x64xf32> to vector<192x64xf32>
    %cst_31 = arith.constant dense<0.000000e+00> : vector<16x64xf32>
    %53 = tpu.matmul %43, %52, %cst_31 {dimension_numbers = #tpu.dot_dimension_numbers<[1], [0], [0], [1], [0, 0, 1, 1], [], []>} : vector<16x192xf32>, vector<192x64xf32>, vector<16x64xf32> -> vector<16x64xf32>
    %c0_32 = arith.constant 0 : index
    %c1_33 = arith.constant 1 : index
    %c0_34 = arith.constant 0 : index
    %c0_35 = arith.constant 0 : index
    %54 = vector.load %arg7[%c0_32, %c1_33, %c0_34, %c0_35] : memref<5x2x1x64xf32, #tpu.memory_space<vmem>>, vector<1x1x1x64xf32>
    %55 = vector.shape_cast %54 : vector<1x1x1x64xf32> to vector<1x64xf32>
    %56 = vector.broadcast %55 : vector<1x64xf32> to vector<16x64xf32>
    %57 = arith.addf %53, %56 : vector<16x64xf32>
    %58 = arith.negf %57 : vector<16x64xf32>
    %59 = math.exp %58 : vector<16x64xf32>
    %cst_36 = arith.constant 1.000000e+00 : f32
    %60 = vector.broadcast %cst_36 : f32 to vector<16x64xf32>
    %61 = arith.addf %60, %59 : vector<16x64xf32>
    %62 = arith.divf %60, %61 : vector<16x64xf32>
    %63 = arith.mulf %50, %62 : vector<16x64xf32>
    %64 = arith.addf %63, %11 : vector<16x64xf32>
    %c1_i32_37 = arith.constant 1 : i32
    %65 = tpu.dynamic_rotate %64 by %c1_i32_37 dim 0 : vector<16x64xf32>, i32 -> vector<16x64xf32>
    %cst_38 = arith.constant 0.000000e+00 : f32
    %66 = vector.shape_cast %30 : vector<16x1xi1> to vector<16x1xi1>
    %67 = vector.broadcast %66 : vector<16x1xi1> to vector<16x64xi1>
    %68 = vector.broadcast %cst_38 : f32 to vector<16x64xf32>
    %69 = arith.select %67, %68, %65 : vector<16x64xi1>, vector<16x64xf32>
    %c15_i32_39 = arith.constant 15 : i32
    %70 = tpu.dynamic_rotate %64 by %c15_i32_39 dim 0 : vector<16x64xf32>, i32 -> vector<16x64xf32>
    %cst_40 = arith.constant 0.000000e+00 : f32
    %71 = vector.shape_cast %32 : vector<16x1xi1> to vector<16x1xi1>
    %72 = vector.broadcast %71 : vector<16x1xi1> to vector<16x64xi1>
    %73 = vector.broadcast %cst_40 : f32 to vector<16x64xf32>
    %74 = arith.select %72, %73, %70 : vector<16x64xi1>, vector<16x64xf32>
    %75 = tpu.concatenate %69, %64, %74 in 1 : vector<16x64xf32>, vector<16x64xf32>, vector<16x64xf32> -> vector<16x192xf32>
    %c1_41 = arith.constant 1 : index
    %c0_42 = arith.constant 0 : index
    %c0_43 = arith.constant 0 : index
    %c0_44 = arith.constant 0 : index
    %76 = vector.load %arg6[%c1_41, %c0_42, %c0_43, %c0_44] : memref<5x2x192x64xf32, #tpu.memory_space<vmem>>, vector<1x1x192x64xf32>
    %77 = vector.shape_cast %76 : vector<1x1x192x64xf32> to vector<192x64xf32>
    %cst_45 = arith.constant dense<0.000000e+00> : vector<16x64xf32>
    %78 = tpu.matmul %75, %77, %cst_45 {dimension_numbers = #tpu.dot_dimension_numbers<[1], [0], [0], [1], [0, 0, 1, 1], [], []>} : vector<16x192xf32>, vector<192x64xf32>, vector<16x64xf32> -> vector<16x64xf32>
    %c1_46 = arith.constant 1 : index
    %c0_47 = arith.constant 0 : index
    %c0_48 = arith.constant 0 : index
    %c0_49 = arith.constant 0 : index
    %79 = vector.load %arg7[%c1_46, %c0_47, %c0_48, %c0_49] : memref<5x2x1x64xf32, #tpu.memory_space<vmem>>, vector<1x1x1x64xf32>
    %80 = vector.shape_cast %79 : vector<1x1x1x64xf32> to vector<1x64xf32>
    %81 = vector.broadcast %80 : vector<1x64xf32> to vector<16x64xf32>
    %82 = arith.addf %78, %81 : vector<16x64xf32>
    %c1_50 = arith.constant 1 : index
    %c1_51 = arith.constant 1 : index
    %c0_52 = arith.constant 0 : index
    %c0_53 = arith.constant 0 : index
    %83 = vector.load %arg6[%c1_50, %c1_51, %c0_52, %c0_53] : memref<5x2x192x64xf32, #tpu.memory_space<vmem>>, vector<1x1x192x64xf32>
    %84 = vector.shape_cast %83 : vector<1x1x192x64xf32> to vector<192x64xf32>
    %cst_54 = arith.constant dense<0.000000e+00> : vector<16x64xf32>
    %85 = tpu.matmul %75, %84, %cst_54 {dimension_numbers = #tpu.dot_dimension_numbers<[1], [0], [0], [1], [0, 0, 1, 1], [], []>} : vector<16x192xf32>, vector<192x64xf32>, vector<16x64xf32> -> vector<16x64xf32>
    %c1_55 = arith.constant 1 : index
    %c1_56 = arith.constant 1 : index
    %c0_57 = arith.constant 0 : index
    %c0_58 = arith.constant 0 : index
    %86 = vector.load %arg7[%c1_55, %c1_56, %c0_57, %c0_58] : memref<5x2x1x64xf32, #tpu.memory_space<vmem>>, vector<1x1x1x64xf32>
    %87 = vector.shape_cast %86 : vector<1x1x1x64xf32> to vector<1x64xf32>
    %88 = vector.broadcast %87 : vector<1x64xf32> to vector<16x64xf32>
    %89 = arith.addf %85, %88 : vector<16x64xf32>
    %90 = arith.negf %89 : vector<16x64xf32>
    %91 = math.exp %90 : vector<16x64xf32>
    %cst_59 = arith.constant 1.000000e+00 : f32
    %92 = vector.broadcast %cst_59 : f32 to vector<16x64xf32>
    %93 = arith.addf %92, %91 : vector<16x64xf32>
    %94 = arith.divf %92, %93 : vector<16x64xf32>
    %95 = arith.mulf %82, %94 : vector<16x64xf32>
    %96 = arith.addf %95, %64 : vector<16x64xf32>
    %c1_i32_60 = arith.constant 1 : i32
    %97 = tpu.dynamic_rotate %96 by %c1_i32_60 dim 0 : vector<16x64xf32>, i32 -> vector<16x64xf32>
    %cst_61 = arith.constant 0.000000e+00 : f32
    %98 = vector.shape_cast %30 : vector<16x1xi1> to vector<16x1xi1>
    %99 = vector.broadcast %98 : vector<16x1xi1> to vector<16x64xi1>
    %100 = vector.broadcast %cst_61 : f32 to vector<16x64xf32>
    %101 = arith.select %99, %100, %97 : vector<16x64xi1>, vector<16x64xf32>
    %c15_i32_62 = arith.constant 15 : i32
    %102 = tpu.dynamic_rotate %96 by %c15_i32_62 dim 0 : vector<16x64xf32>, i32 -> vector<16x64xf32>
    %cst_63 = arith.constant 0.000000e+00 : f32
    %103 = vector.shape_cast %32 : vector<16x1xi1> to vector<16x1xi1>
    %104 = vector.broadcast %103 : vector<16x1xi1> to vector<16x64xi1>
    %105 = vector.broadcast %cst_63 : f32 to vector<16x64xf32>
    %106 = arith.select %104, %105, %102 : vector<16x64xi1>, vector<16x64xf32>
    %107 = tpu.concatenate %101, %96, %106 in 1 : vector<16x64xf32>, vector<16x64xf32>, vector<16x64xf32> -> vector<16x192xf32>
    %c2 = arith.constant 2 : index
    %c0_64 = arith.constant 0 : index
    %c0_65 = arith.constant 0 : index
    %c0_66 = arith.constant 0 : index
    %108 = vector.load %arg6[%c2, %c0_64, %c0_65, %c0_66] : memref<5x2x192x64xf32, #tpu.memory_space<vmem>>, vector<1x1x192x64xf32>
    %109 = vector.shape_cast %108 : vector<1x1x192x64xf32> to vector<192x64xf32>
    %cst_67 = arith.constant dense<0.000000e+00> : vector<16x64xf32>
    %110 = tpu.matmul %107, %109, %cst_67 {dimension_numbers = #tpu.dot_dimension_numbers<[1], [0], [0], [1], [0, 0, 1, 1], [], []>} : vector<16x192xf32>, vector<192x64xf32>, vector<16x64xf32> -> vector<16x64xf32>
    %c2_68 = arith.constant 2 : index
    %c0_69 = arith.constant 0 : index
    %c0_70 = arith.constant 0 : index
    %c0_71 = arith.constant 0 : index
    %111 = vector.load %arg7[%c2_68, %c0_69, %c0_70, %c0_71] : memref<5x2x1x64xf32, #tpu.memory_space<vmem>>, vector<1x1x1x64xf32>
    %112 = vector.shape_cast %111 : vector<1x1x1x64xf32> to vector<1x64xf32>
    %113 = vector.broadcast %112 : vector<1x64xf32> to vector<16x64xf32>
    %114 = arith.addf %110, %113 : vector<16x64xf32>
    %c2_72 = arith.constant 2 : index
    %c1_73 = arith.constant 1 : index
    %c0_74 = arith.constant 0 : index
    %c0_75 = arith.constant 0 : index
    %115 = vector.load %arg6[%c2_72, %c1_73, %c0_74, %c0_75] : memref<5x2x192x64xf32, #tpu.memory_space<vmem>>, vector<1x1x192x64xf32>
    %116 = vector.shape_cast %115 : vector<1x1x192x64xf32> to vector<192x64xf32>
    %cst_76 = arith.constant dense<0.000000e+00> : vector<16x64xf32>
    %117 = tpu.matmul %107, %116, %cst_76 {dimension_numbers = #tpu.dot_dimension_numbers<[1], [0], [0], [1], [0, 0, 1, 1], [], []>} : vector<16x192xf32>, vector<192x64xf32>, vector<16x64xf32> -> vector<16x64xf32>
    %c2_77 = arith.constant 2 : index
    %c1_78 = arith.constant 1 : index
    %c0_79 = arith.constant 0 : index
    %c0_80 = arith.constant 0 : index
    %118 = vector.load %arg7[%c2_77, %c1_78, %c0_79, %c0_80] : memref<5x2x1x64xf32, #tpu.memory_space<vmem>>, vector<1x1x1x64xf32>
    %119 = vector.shape_cast %118 : vector<1x1x1x64xf32> to vector<1x64xf32>
    %120 = vector.broadcast %119 : vector<1x64xf32> to vector<16x64xf32>
    %121 = arith.addf %117, %120 : vector<16x64xf32>
    %122 = arith.negf %121 : vector<16x64xf32>
    %123 = math.exp %122 : vector<16x64xf32>
    %cst_81 = arith.constant 1.000000e+00 : f32
    %124 = vector.broadcast %cst_81 : f32 to vector<16x64xf32>
    %125 = arith.addf %124, %123 : vector<16x64xf32>
    %126 = arith.divf %124, %125 : vector<16x64xf32>
    %127 = arith.mulf %114, %126 : vector<16x64xf32>
    %128 = arith.addf %127, %96 : vector<16x64xf32>
    %c1_i32_82 = arith.constant 1 : i32
    %129 = tpu.dynamic_rotate %128 by %c1_i32_82 dim 0 : vector<16x64xf32>, i32 -> vector<16x64xf32>
    %cst_83 = arith.constant 0.000000e+00 : f32
    %130 = vector.shape_cast %30 : vector<16x1xi1> to vector<16x1xi1>
    %131 = vector.broadcast %130 : vector<16x1xi1> to vector<16x64xi1>
    %132 = vector.broadcast %cst_83 : f32 to vector<16x64xf32>
    %133 = arith.select %131, %132, %129 : vector<16x64xi1>, vector<16x64xf32>
    %c15_i32_84 = arith.constant 15 : i32
    %134 = tpu.dynamic_rotate %128 by %c15_i32_84 dim 0 : vector<16x64xf32>, i32 -> vector<16x64xf32>
    %cst_85 = arith.constant 0.000000e+00 : f32
    %135 = vector.shape_cast %32 : vector<16x1xi1> to vector<16x1xi1>
    %136 = vector.broadcast %135 : vector<16x1xi1> to vector<16x64xi1>
    %137 = vector.broadcast %cst_85 : f32 to vector<16x64xf32>
    %138 = arith.select %136, %137, %134 : vector<16x64xi1>, vector<16x64xf32>
    %139 = tpu.concatenate %133, %128, %138 in 1 : vector<16x64xf32>, vector<16x64xf32>, vector<16x64xf32> -> vector<16x192xf32>
    %c3 = arith.constant 3 : index
    %c0_86 = arith.constant 0 : index
    %c0_87 = arith.constant 0 : index
    %c0_88 = arith.constant 0 : index
    %140 = vector.load %arg6[%c3, %c0_86, %c0_87, %c0_88] : memref<5x2x192x64xf32, #tpu.memory_space<vmem>>, vector<1x1x192x64xf32>
    %141 = vector.shape_cast %140 : vector<1x1x192x64xf32> to vector<192x64xf32>
    %cst_89 = arith.constant dense<0.000000e+00> : vector<16x64xf32>
    %142 = tpu.matmul %139, %141, %cst_89 {dimension_numbers = #tpu.dot_dimension_numbers<[1], [0], [0], [1], [0, 0, 1, 1], [], []>} : vector<16x192xf32>, vector<192x64xf32>, vector<16x64xf32> -> vector<16x64xf32>
    %c3_90 = arith.constant 3 : index
    %c0_91 = arith.constant 0 : index
    %c0_92 = arith.constant 0 : index
    %c0_93 = arith.constant 0 : index
    %143 = vector.load %arg7[%c3_90, %c0_91, %c0_92, %c0_93] : memref<5x2x1x64xf32, #tpu.memory_space<vmem>>, vector<1x1x1x64xf32>
    %144 = vector.shape_cast %143 : vector<1x1x1x64xf32> to vector<1x64xf32>
    %145 = vector.broadcast %144 : vector<1x64xf32> to vector<16x64xf32>
    %146 = arith.addf %142, %145 : vector<16x64xf32>
    %c3_94 = arith.constant 3 : index
    %c1_95 = arith.constant 1 : index
    %c0_96 = arith.constant 0 : index
    %c0_97 = arith.constant 0 : index
    %147 = vector.load %arg6[%c3_94, %c1_95, %c0_96, %c0_97] : memref<5x2x192x64xf32, #tpu.memory_space<vmem>>, vector<1x1x192x64xf32>
    %148 = vector.shape_cast %147 : vector<1x1x192x64xf32> to vector<192x64xf32>
    %cst_98 = arith.constant dense<0.000000e+00> : vector<16x64xf32>
    %149 = tpu.matmul %139, %148, %cst_98 {dimension_numbers = #tpu.dot_dimension_numbers<[1], [0], [0], [1], [0, 0, 1, 1], [], []>} : vector<16x192xf32>, vector<192x64xf32>, vector<16x64xf32> -> vector<16x64xf32>
    %c3_99 = arith.constant 3 : index
    %c1_100 = arith.constant 1 : index
    %c0_101 = arith.constant 0 : index
    %c0_102 = arith.constant 0 : index
    %150 = vector.load %arg7[%c3_99, %c1_100, %c0_101, %c0_102] : memref<5x2x1x64xf32, #tpu.memory_space<vmem>>, vector<1x1x1x64xf32>
    %151 = vector.shape_cast %150 : vector<1x1x1x64xf32> to vector<1x64xf32>
    %152 = vector.broadcast %151 : vector<1x64xf32> to vector<16x64xf32>
    %153 = arith.addf %149, %152 : vector<16x64xf32>
    %154 = arith.negf %153 : vector<16x64xf32>
    %155 = math.exp %154 : vector<16x64xf32>
    %cst_103 = arith.constant 1.000000e+00 : f32
    %156 = vector.broadcast %cst_103 : f32 to vector<16x64xf32>
    %157 = arith.addf %156, %155 : vector<16x64xf32>
    %158 = arith.divf %156, %157 : vector<16x64xf32>
    %159 = arith.mulf %146, %158 : vector<16x64xf32>
    %160 = arith.addf %159, %128 : vector<16x64xf32>
    %c1_i32_104 = arith.constant 1 : i32
    %161 = tpu.dynamic_rotate %160 by %c1_i32_104 dim 0 : vector<16x64xf32>, i32 -> vector<16x64xf32>
    %cst_105 = arith.constant 0.000000e+00 : f32
    %162 = vector.shape_cast %30 : vector<16x1xi1> to vector<16x1xi1>
    %163 = vector.broadcast %162 : vector<16x1xi1> to vector<16x64xi1>
    %164 = vector.broadcast %cst_105 : f32 to vector<16x64xf32>
    %165 = arith.select %163, %164, %161 : vector<16x64xi1>, vector<16x64xf32>
    %c15_i32_106 = arith.constant 15 : i32
    %166 = tpu.dynamic_rotate %160 by %c15_i32_106 dim 0 : vector<16x64xf32>, i32 -> vector<16x64xf32>
    %cst_107 = arith.constant 0.000000e+00 : f32
    %167 = vector.shape_cast %32 : vector<16x1xi1> to vector<16x1xi1>
    %168 = vector.broadcast %167 : vector<16x1xi1> to vector<16x64xi1>
    %169 = vector.broadcast %cst_107 : f32 to vector<16x64xf32>
    %170 = arith.select %168, %169, %166 : vector<16x64xi1>, vector<16x64xf32>
    %171 = tpu.concatenate %165, %160, %170 in 1 : vector<16x64xf32>, vector<16x64xf32>, vector<16x64xf32> -> vector<16x192xf32>
    %c4 = arith.constant 4 : index
    %c0_108 = arith.constant 0 : index
    %c0_109 = arith.constant 0 : index
    %c0_110 = arith.constant 0 : index
    %172 = vector.load %arg6[%c4, %c0_108, %c0_109, %c0_110] : memref<5x2x192x64xf32, #tpu.memory_space<vmem>>, vector<1x1x192x64xf32>
    %173 = vector.shape_cast %172 : vector<1x1x192x64xf32> to vector<192x64xf32>
    %cst_111 = arith.constant dense<0.000000e+00> : vector<16x64xf32>
    %174 = tpu.matmul %171, %173, %cst_111 {dimension_numbers = #tpu.dot_dimension_numbers<[1], [0], [0], [1], [0, 0, 1, 1], [], []>} : vector<16x192xf32>, vector<192x64xf32>, vector<16x64xf32> -> vector<16x64xf32>
    %c4_112 = arith.constant 4 : index
    %c0_113 = arith.constant 0 : index
    %c0_114 = arith.constant 0 : index
    %c0_115 = arith.constant 0 : index
    %175 = vector.load %arg7[%c4_112, %c0_113, %c0_114, %c0_115] : memref<5x2x1x64xf32, #tpu.memory_space<vmem>>, vector<1x1x1x64xf32>
    %176 = vector.shape_cast %175 : vector<1x1x1x64xf32> to vector<1x64xf32>
    %177 = vector.broadcast %176 : vector<1x64xf32> to vector<16x64xf32>
    %178 = arith.addf %174, %177 : vector<16x64xf32>
    %c4_116 = arith.constant 4 : index
    %c1_117 = arith.constant 1 : index
    %c0_118 = arith.constant 0 : index
    %c0_119 = arith.constant 0 : index
    %179 = vector.load %arg6[%c4_116, %c1_117, %c0_118, %c0_119] : memref<5x2x192x64xf32, #tpu.memory_space<vmem>>, vector<1x1x192x64xf32>
    %180 = vector.shape_cast %179 : vector<1x1x192x64xf32> to vector<192x64xf32>
    %cst_120 = arith.constant dense<0.000000e+00> : vector<16x64xf32>
    %181 = tpu.matmul %171, %180, %cst_120 {dimension_numbers = #tpu.dot_dimension_numbers<[1], [0], [0], [1], [0, 0, 1, 1], [], []>} : vector<16x192xf32>, vector<192x64xf32>, vector<16x64xf32> -> vector<16x64xf32>
    %c4_121 = arith.constant 4 : index
    %c1_122 = arith.constant 1 : index
    %c0_123 = arith.constant 0 : index
    %c0_124 = arith.constant 0 : index
    %182 = vector.load %arg7[%c4_121, %c1_122, %c0_123, %c0_124] : memref<5x2x1x64xf32, #tpu.memory_space<vmem>>, vector<1x1x1x64xf32>
    %183 = vector.shape_cast %182 : vector<1x1x1x64xf32> to vector<1x64xf32>
    %184 = vector.broadcast %183 : vector<1x64xf32> to vector<16x64xf32>
    %185 = arith.addf %181, %184 : vector<16x64xf32>
    %186 = arith.negf %185 : vector<16x64xf32>
    %187 = math.exp %186 : vector<16x64xf32>
    %cst_125 = arith.constant 1.000000e+00 : f32
    %188 = vector.broadcast %cst_125 : f32 to vector<16x64xf32>
    %189 = arith.addf %188, %187 : vector<16x64xf32>
    %190 = arith.divf %188, %189 : vector<16x64xf32>
    %191 = arith.mulf %178, %190 : vector<16x64xf32>
    %192 = arith.addf %191, %160 : vector<16x64xf32>
    %c0_126 = arith.constant 0 : index
    %c0_127 = arith.constant 0 : index
    %193 = vector.load %arg8[%c0_126, %c0_127] : memref<64x16xf32, #tpu.memory_space<vmem>>, vector<64x16xf32>
    %cst_128 = arith.constant dense<0.000000e+00> : vector<16x16xf32>
    %194 = tpu.matmul %192, %193, %cst_128 {dimension_numbers = #tpu.dot_dimension_numbers<[1], [0], [0], [1], [0, 0, 1, 1], [], []>} : vector<16x64xf32>, vector<64x16xf32>, vector<16x16xf32> -> vector<16x16xf32>
    %c0_129 = arith.constant 0 : index
    %c0_130 = arith.constant 0 : index
    %195 = vector.load %arg9[%c0_129, %c0_130] : memref<1x16xf32, #tpu.memory_space<vmem>>, vector<1x16xf32>
    %196 = vector.broadcast %195 : vector<1x16xf32> to vector<16x16xf32>
    %197 = arith.addf %194, %196 : vector<16x16xf32>
    %c0_131 = arith.constant 0 : index
    %c0_132 = arith.constant 0 : index
    %198 = vector.load %arg11[%c0_131, %c0_132] : memref<16x16xf32, #tpu.memory_space<vmem>>, vector<16x16xf32>
    %199 = arith.addf %197, %198 : vector<16x16xf32>
    %200 = tpu.concatenate %197, %199 in 1 : vector<16x16xf32>, vector<16x16xf32> -> vector<16x32xf32>
    %c0_133 = arith.constant 0 : index
    %c0_134 = arith.constant 0 : index
    %201 = vector.load %arg10[%c0_133, %c0_134] : memref<16x32xf32, #tpu.memory_space<vmem>>, vector<16x32xf32>
    tpu.vector_store %arg10[%c0_133, %c0_134], %200 {strides = array<i32>} : memref<16x32xf32, #tpu.memory_space<vmem>>, vector<16x32xf32>,
    return
  }
  func.func @transform_0(%arg0: i32) -> (i32, i32) {
    %c0_i32 = arith.constant 0 : i32
    %c0_i32_0 = arith.constant 0 : i32
    return %arg0, %c0_i32 : i32, i32
  }
  func.func @transform_1(%arg0: i32) -> (i32, i32) {
    %c0_i32 = arith.constant 0 : i32
    %c0_i32_0 = arith.constant 0 : i32
    %c0_i32_1 = arith.constant 0 : i32
    return %c0_i32, %c0_i32_0 : i32, i32
  }
  func.func @transform_2(%arg0: i32) -> (i32, i32) {
    %c0_i32 = arith.constant 0 : i32
    %c0_i32_0 = arith.constant 0 : i32
    %c0_i32_1 = arith.constant 0 : i32
    return %c0_i32, %c0_i32_0 : i32, i32
  }
  func.func @transform_3(%arg0: i32) -> (i32, i32) {
    %c0_i32 = arith.constant 0 : i32
    %c0_i32_0 = arith.constant 0 : i32
    %c0_i32_1 = arith.constant 0 : i32
    return %c0_i32, %c0_i32_0 : i32, i32
  }
  func.func @transform_4(%arg0: i32) -> (i32, i32) {
    %c0_i32 = arith.constant 0 : i32
    %c0_i32_0 = arith.constant 0 : i32
    %c0_i32_1 = arith.constant 0 : i32
    return %c0_i32, %c0_i32_0 : i32, i32
  }
  func.func @transform_5(%arg0: i32) -> (i32, i32, i32, i32) {
    %c0_i32 = arith.constant 0 : i32
    %c0_i32_0 = arith.constant 0 : i32
    %c0_i32_1 = arith.constant 0 : i32
    %c0_i32_2 = arith.constant 0 : i32
    %c0_i32_3 = arith.constant 0 : i32
    return %c0_i32, %c0_i32_0, %c0_i32_1, %c0_i32_2 : i32, i32, i32, i32
  }
  func.func @transform_6(%arg0: i32) -> (i32, i32, i32, i32) {
    %c0_i32 = arith.constant 0 : i32
    %c0_i32_0 = arith.constant 0 : i32
    %c0_i32_1 = arith.constant 0 : i32
    %c0_i32_2 = arith.constant 0 : i32
    %c0_i32_3 = arith.constant 0 : i32
    return %c0_i32, %c0_i32_0, %c0_i32_1, %c0_i32_2 : i32, i32, i32, i32
  }
  func.func @transform_7(%arg0: i32) -> (i32, i32) {
    %c0_i32 = arith.constant 0 : i32
    %c0_i32_0 = arith.constant 0 : i32
    %c0_i32_1 = arith.constant 0 : i32
    return %c0_i32, %c0_i32_0 : i32, i32
  }
  func.func @transform_8(%arg0: i32) -> (i32, i32) {
    %c0_i32 = arith.constant 0 : i32
    %c0_i32_0 = arith.constant 0 : i32
    %c0_i32_1 = arith.constant 0 : i32
    return %c0_i32, %c0_i32_0 : i32, i32
  }
  func.func @transform_9(%arg0: i32) -> (i32, i32) {
    %c0_i32 = arith.constant 0 : i32
    %c0_i32_0 = arith.constant 0 : i32
    return %arg0, %c0_i32 : i32, i32
  }
}

</mosaic_0001>

<bundles_post_ra>
// kernel: tpu_custom_call.1
= control target key start
LH: loop header
LB: loop body
LE: loop exit
PB: predicated region body
PF: predicated region fallthrough
CT: control target
= control target key end

     0   :  { %vm47_vm0 = vcmask 1043456   ;;  %vm40_vm1 = vcmask 31744   ;;  %s2778_s0 = inlined_call_operand.vmem [shape: f32[16,4], index: 0, kind: input, shape index: {}]   ;;  %s2779_s1 = inlined_call_operand.vmem [shape: f32[4,16], index: 1, kind: input, shape index: {}]   ;;  %s2780_s2 = inlined_call_operand.vmem [shape: f32[1,16], index: 2, kind: input, shape index: {}]   ;;  %s2781_s3 = inlined_call_operand.vmem [shape: f32[16,64], index: 3, kind: input, shape index: {}]   ;;  %s2782_s4 = inlined_call_operand.vmem [shape: f32[1,64], index: 4, kind: input, shape index: {}]   ;;  %s2783_s5 = inlined_call_operand.vmem [shape: f32[5,2,192,64], index: 5, kind: input, shape index: {}]   ;;  %s2784_s6 = inlined_call_operand.vmem [shape: f32[5,2,1,64], index: 6, kind: input, shape index: {}]   ;;  %s2785_s7 = inlined_call_operand.vmem [shape: f32[64,16], index: 7, kind: input, shape index: {}]   ;;  %s2786_s8 = inlined_call_operand.vmem [shape: f32[1,16], index: 8, kind: input, shape index: {}]   ;;  %s2787_s9 = inlined_call_operand.hbm [shape: f32[16,32], index: 9, kind: output, shape index: {}]  }
   0x1   :  { %v35_v0 = vld [vmem:[%s2779_s1] sm:$0xf] }
   0x2   :  { %v33_v1 = vld [vmem:[%s2778_s0] sm:$0xff]  ;;  %1338 = vmatpush.msk.msra.mxu0 %vm47_vm0, %v35_v0 }
   0x3   :  { %1339 = vmatmul.msk.f32.vlgmr.msra.gmra.mxu0 %vm40_vm1, %v33_v1 }
   0x4   :  { %14 = vsyncpa [#allocation4], 0  ;;  %v34_v2 = vld [vmem:[%s2778_s0 + $0x8] sm:$0xff]  ;;  %v77_v4 = vld [vmem:[%s2781_s3] sm:$0xff]  ;;  %vm74_vm2 = vcmask 130048   ;;  %v112_v41 = vlaneseq  ;;  %s1684_s28 = smov 64  }
   0x5   :  { %v78_v3 = vld [vmem:[%s2781_s3 + $0x8] sm:$0xff]  ;;  %v1605_v5 = vld [vmem:[%s2780_s2] ss:$0 sm:$0xff]  ;;  %v199_v10 = vld [vmem:[%s2783_s5 + $0xb8] sm:$0xff]  ;;  %vm173_vm5 = vcmask 523264   ;;  %s1685_s11 = smov 16  }
   0x6   :  { %103 = vmatpush.msra.mxu1 %v78_v3  ;;  %v1368_v11 = vld [vmem:[%s2783_s5 + $0x178] sm:$0xff]  ;;  %241 = vmatpush.msra.mxu3 %v199_v10  ;;  %v198_v12 = vld [vmem:[%s2783_s5 + $0xb0] sm:$0xff]  ;;  %v197_v14 = vld [vmem:[%s2783_s5 + $0xa8] sm:$0xff]  ;;  %v1864_v46 = vshrl.u32 %v112_v41, 7  ;;  %s1686_s12 = smov [#allocation3]   ;;  %s1326_s15 = sshll.u32 %s2787_s9, 4  ;;  %s1327_s15 = int_to_ptr.hbm [resolvable:$true] %s1326_s15 }
   0x7   :  { %v1367_v13 = vld [vmem:[%s2783_s5 + $0x170] sm:$0xff]  ;;  %v1366_v15 = vld [vmem:[%s2783_s5 + $0x168] sm:$0xff]  ;;  %v196_v16 = vld [vmem:[%s2783_s5 + $0xa0] sm:$0xff]  ;;  %s1324_s13 = sshll.u32 %s1686_s12, 4  ;;  %s1687_s16 = smov 128   ;;  %s1325_s13 = int_to_ptr.vmem [resolvable:$true] %s1324_s13 }
   0x8   :  { %104 = vmatpush.msra.mxu1 %v77_v4  ;;  %242 = vmatpush.msra.mxu3 %v198_v12  ;;  %v1365_v17 = vld [vmem:[%s2783_s5 + $0x160] sm:$0xff]  ;;  %v195_v18 = vld [vmem:[%s2783_s5 + $0x98] sm:$0xff]  ;;  %v194_v20 = vld [vmem:[%s2783_s5 + $0x90] sm:$0xff]  ;;  %v119_v49 = vand.u32 7, %v1864_v46  ;;  %vm156_vm3 = vcmp.lt.s32.totalorder %v1864_v46, 7  ;;  %v114_v59 = vadd.s32 8, %v1864_v46 }
   0x9   :  { %v1364_v19 = vld [vmem:[%s2783_s5 + $0x158] sm:$0xff]  ;;  %v1363_v21 = vld [vmem:[%s2783_s5 + $0x150] sm:$0xff]  ;;  %v193_v22 = vld [vmem:[%s2783_s5 + $0x88] sm:$0xff]  ;;  %vm145_vm7 = vcmp.lt.s32.totalorder %v1864_v46, 1  ;;  %s1688_s1 = smov 8  }
   0xa   :  { %317 = vmatpush.msrb.mxu1 %v1368_v11  ;;  %243 = vmatpush.msra.mxu3 %v197_v14  ;;  %v1362_v23 = vld [vmem:[%s2783_s5 + $0x148] sm:$0xff]  ;;  %v192_v24 = vld [vmem:[%s2783_s5 + $0x80] sm:$0xff]  ;;  %v191_v26 = vld [vmem:[%s2783_s5 + $0x78] sm:$0xff]  ;;  %vm1890_vm4 = vcmp.eq.s32.totalorder %v119_v49, 7  ;;  %vm1946_vm8 = vcmp.eq.s32.totalorder %v119_v49, 0 }
   0xb   :  { %1340 = vmatmul.msk.f32.gmra.mxu0 %vm40_vm1, %v34_v2  ;;  %v1361_v25 = vld [vmem:[%s2783_s5 + $0x140] sm:$0xff]  ;;  %v1360_v27 = vld [vmem:[%s2783_s5 + $0x138] sm:$0xff]  ;;  %v190_v28 = vld [vmem:[%s2783_s5 + $0x70] sm:$0xff]  ;;  %210 = vmatpush.msra.mxu2 %v191_v26  ;;  %v126_v2 = vand.u32 7, %v114_v59 }
   0xc   :  { %318 = vmatpush.msrb.mxu1 %v1367_v13  ;;  %244 = vmatpush.msra.mxu3 %v196_v16  ;;  %v1359_v29 = vld [vmem:[%s2783_s5 + $0x130] sm:$0xff]  ;;  %v189_v30 = vld [vmem:[%s2783_s5 + $0x68] sm:$0xff]  ;;  %v188_v32 = vld [vmem:[%s2783_s5 + $0x60] sm:$0xff] }
   0xd   :  { %286 = vmatpush.msrb.mxu0 %v1360_v27  ;;  %v1358_v31 = vld [vmem:[%s2783_s5 + $0x128] sm:$0xff]  ;;  %211 = vmatpush.msra.mxu2 %v190_v28  ;;  %v1357_v33 = vld [vmem:[%s2783_s5 + $0x120] sm:$0xff]  ;;  %v187_v35 = vld [vmem:[%s2783_s5 + $0x58] sm:$0xff]  ;;  %vm1927_vm6 = vcmp.eq.s32.totalorder %v126_v2, 7  ;;  %vm1955_vm9 = vcmp.eq.s32.totalorder %v126_v2, 0 }
   0xe   :  { %319 = vmatpush.msrb.mxu1 %v1366_v15  ;;  %245 = vmatpush.msra.mxu3 %v195_v18  ;;  %v1606_v34 = vld [vmem:[%s2782_s4] ss:$0 sm:$0xff]  ;;  %v1356_v36 = vld [vmem:[%s2783_s5 + $0x118] sm:$0xff]  ;;  %v186_v37 = vld [vmem:[%s2783_s5 + $0x50] sm:$0xff] }
   0xf   :  { %287 = vmatpush.msrb.mxu0 %v1359_v29  ;;  %212 = vmatpush.msra.mxu2 %v189_v30  ;;  %v1355_v38 = vld [vmem:[%s2783_s5 + $0x110] sm:$0xff]  ;;  %v185_v42 = vld [vmem:[%s2783_s5 + $0x48] sm:$0xff]  ;;  %v184_v44 = vld [vmem:[%s2783_s5 + $0x40] sm:$0xff] }
  0x10   :  { %320 = vmatpush.msrb.mxu1 %v1365_v17  ;;  %246 = vmatpush.msra.mxu3 %v194_v20  ;;  %v1354_v43 = vld [vmem:[%s2783_s5 + $0x108] sm:$0xff]  ;;  %v1353_v45 = vld [vmem:[%s2783_s5 + $0x100] sm:$0xff]  ;;  %v183_v47 = vld [vmem:[%s2783_s5 + $0x38] sm:$0xff] }
  0x11   :  { %288 = vmatpush.msrb.mxu0 %v1358_v31  ;;  %213 = vmatpush.msra.mxu2 %v188_v32  ;;  %v1352_v48 = vld [vmem:[%s2783_s5 + $0xf8] sm:$0xff]  ;;  %v182_v50 = vld [vmem:[%s2783_s5 + $0x30] sm:$0xff]  ;;  %v181_v54 = vld [vmem:[%s2783_s5 + $0x28] sm:$0xff] }
  0x12   :  { %321 = vmatpush.msrb.mxu1 %v1364_v19  ;;  %247 = vmatpush.msra.mxu3 %v193_v22  ;;  %v1351_v51 = vld [vmem:[%s2783_s5 + $0xf0] sm:$0xff]  ;;  %v1350_v55 = vld [vmem:[%s2783_s5 + $0xe8] sm:$0xff]  ;;  %v180_v60 = vld [vmem:[%s2783_s5 + $0x20] sm:$0xff] }
  0x13   :  { %289 = vmatpush.msrb.mxu0 %v1357_v33  ;;  %214 = vmatpush.msra.mxu2 %v187_v35  ;;  %v1349_v61 = vld [vmem:[%s2783_s5 + $0xe0] sm:$0xff]  ;;  %v179_v63 = vld [vmem:[%s2783_s5 + $0x18] sm:$0xff]  ;;  %v178_v3 = vld [vmem:[%s2783_s5 + $0x10] sm:$0xff] }
  0x14   :  { %322 = vmatpush.msrb.mxu1 %v1363_v21  ;;  %248 = vmatpush.msra.mxu3 %v192_v24  ;;  %v1348_v0 = vld [vmem:[%s2783_s5 + $0xd8] sm:$0xff]  ;;  %v1347_v4 = vld [vmem:[%s2783_s5 + $0xd0] sm:$0xff]  ;;  %v176_v10 = vld [vmem:[%s2783_s5] sm:$0xff] }
  0x15   :  { %290 = vmatpush.msrb.mxu0 %v1356_v36  ;;  %215 = vmatpush.msra.mxu2 %v186_v37  ;;  %v1345_v11 = vld [vmem:[%s2783_s5 + $0xc0] sm:$0xff]  ;;  %v1397_v28 = vld [vmem:[%s2783_s5 + $0x238] sm:$0xff]  ;;  %v1396_v31 = vld [vmem:[%s2783_s5 + $0x230] sm:$0xff] }
  0x16   :  { %323 = vmatpush.msrb.mxu1 %v1362_v23  ;;  %v1607_v24 = vld [vmem:[%s2784_s6 + $0x1] ss:$0 sm:$0xff]  ;;  %v1424_v29 = vld [vmem:[%s2783_s5 + $0x2f8] sm:$0xff]  ;;  %v1423_v32 = vld [vmem:[%s2783_s5 + $0x2f0] sm:$0xff] }
  0x17   :  { %291 = vmatpush.msrb.mxu0 %v1355_v38  ;;  %216 = vmatpush.msra.mxu2 %v185_v42  ;;  %v1422_v35 = vld [vmem:[%s2783_s5 + $0x2e8] sm:$0xff]  ;;  %v1394_v36 = vld [vmem:[%s2783_s5 + $0x220] sm:$0xff]  ;;  %v1393_v41 = vld [vmem:[%s2783_s5 + $0x218] sm:$0xff] }
  0x18   :  { %324 = vmatpush.msrb.mxu1 %v1361_v25  ;;  %v1421_v37 = vld [vmem:[%s2783_s5 + $0x2e0] sm:$0xff]  ;;  %v1420_v42 = vld [vmem:[%s2783_s5 + $0x2d8] sm:$0xff]  ;;  %v1388_v2 = vld [vmem:[%s2783_s5 + $0x1f0] sm:$0xff] }
  0x19   :  { %292 = vmatpush.msrb.mxu0 %v1354_v43  ;;  %217 = vmatpush.msra.mxu2 %v184_v44  ;;  %v1543_v56 = vld [vmem:[%s2783_s5 + $0x608] sm:$0xff]  ;;  %v1269_v14 = vld [vmem:[%s2785_s7 + $0x38] sm:$0xff]  ;;  %v1266_v19 = vld [vmem:[%s2785_s7 + $0x20] sm:$0xff] }
  0x1a   :  { %v1267_v46 = vld [vmem:[%s2785_s7 + $0x28] sm:$0xff] }
  0x1b   :  { %293 = vmatpush.msrb.mxu0 %v1353_v45  ;;  %218 = vmatpush.msra.mxu2 %v183_v47  ;;  %v1392_v45 = vld [vmem:[%s2783_s5 + $0x210] sm:$0xff] }
  0x1c   :  { %v1419_v47 = vld [vmem:[%s2783_s5 + $0x2d0] sm:$0xff] }
  0x1d   :  { %294 = vmatpush.msrb.mxu0 %v1352_v48  ;;  %219 = vmatpush.msra.mxu2 %v182_v50  ;;  %v1391_v50 = vld [vmem:[%s2783_s5 + $0x208] sm:$0xff] }
  0x1f   :  { %295 = vmatpush.msrb.mxu0 %v1351_v51  ;;  %220 = vmatpush.msra.mxu2 %v181_v54  ;;  %v1418_v51 = vld [vmem:[%s2783_s5 + $0x2c8] sm:$0xff] }
  0x21   :  { %296 = vmatpush.msrb.mxu0 %v1350_v55  ;;  %221 = vmatpush.msra.mxu2 %v180_v60  ;;  %v1417_v55 = vld [vmem:[%s2783_s5 + $0x2c0] sm:$0xff] }
  0x23   :  { %297 = vmatpush.msrb.mxu0 %v1349_v61  ;;  %222 = vmatpush.msra.mxu2 %v179_v63  ;;  %v1608_v61 = vld [vmem:[%s2784_s6] ss:$0 sm:$0xff] }
  0x25   :  { %298 = vmatpush.msrb.mxu0 %v1348_v0  ;;  %223 = vmatpush.msra.mxu2 %v178_v3  ;;  %v1389_v0 = vld [vmem:[%s2783_s5 + $0x1f8] sm:$0xff] }
  0x26   :  { %432 = vmatpush.msrb.mxu3 %v1389_v0  ;;  %v1403_v0 = vld [vmem:[%s2783_s5 + $0x250] sm:$0xff] }
  0x27   :  { %299 = vmatpush.msrb.mxu0 %v1347_v4  ;;  %v1415_v4 = vld [vmem:[%s2783_s5 + $0x2b0] sm:$0xff] }
  0x28   :  { %433 = vmatpush.msrb.mxu3 %v1388_v2  ;;  %v1402_v2 = vld [vmem:[%s2783_s5 + $0x248] sm:$0xff] }
  0x80   :  { %v68_v6 = vpop.f32.mrf.mxu0 }
  0x81   :  { %v69_v7 = vadd.f32 %v1605_v5, %v68_v6  ;;  %v1346_v6 = vld [vmem:[%s2783_s5 + $0xc8] sm:$0xff] }
  0x82   :  { %300 = vmatpush.msrb.mxu0 %v1346_v6 }
  0x83   :  { %75 = vst.msk [vmem:[#allocation2] sm:$0xff] %vm74_vm2, %v69_v7  ;;  %1341 = vmatmul.msk.f32.vlgmr.msra.gmra.mxu1 %vm74_vm2, %v69_v7 }
  0x84   :  { %301 = vmatpush.msrb.mxu0 %v1345_v11  ;;  %463 = vmatpush.msra.mxu1 %v1397_v28  ;;  %v1384_v28 = vld [vmem:[%s2783_s5 + $0x1d0] sm:$0xff] }
  0x86   :  { %539 = vmatpush.msra.mxu0 %v1424_v29  ;;  %464 = vmatpush.msra.mxu1 %v1396_v31  ;;  %v1411_v29 = vld [vmem:[%s2783_s5 + $0x290] sm:$0xff] }
  0x88   :  { %v71_v8 = vpop.f32.mrf.mxu0  ;;  %540 = vmatpush.msra.mxu0 %v1423_v32 }
  0x89   :  { %v72_v9 = vadd.f32 %v1605_v5, %v71_v8  ;;  %v177_v5 = vld [vmem:[%s2783_s5 + $0x8] sm:$0xff] }
  0x8a   :  { %224 = vmatpush.msra.mxu2 %v177_v5  ;;  %541 = vmatpush.msra.mxu0 %v1422_v35  ;;  %v1383_v35 = vld [vmem:[%s2783_s5 + $0x1c8] sm:$0xff] }
  0x8b   :  { %76 = vst.msk [vmem:[#allocation2 + $0x8] sm:$0xff] %vm74_vm2, %v72_v9  ;;  %1342 = vmatmul.msk.f32.gmra.mxu1 %vm74_vm2, %v72_v9 }
  0x8c   :  { %225 = vmatpush.msra.mxu2 %v176_v10  ;;  %542 = vmatpush.msra.mxu0 %v1421_v37  ;;  %v1414_v10 = vld [vmem:[%s2783_s5 + $0x2a8] sm:$0xff] }
  0x8e   :  { %543 = vmatpush.msra.mxu0 %v1420_v42 }
  0x90   :  { %544 = vmatpush.msra.mxu0 %v1419_v47 }
  0x92   :  { %545 = vmatpush.msra.mxu0 %v1418_v51 }
  0x94   :  { %546 = vmatpush.msra.mxu0 %v1417_v55 }
 0x100   :  { %v106_v39 = vpop.f32.mrf.mxu1 }
 0x101   :  { %v1848_v40 = vadd.f32 %v1606_v34, %v106_v39 }
 0x103   :  { %167 = vrot.lane.b32.xlu0 %v1848_v40, %s1684_s28  ;;  %v154_v57 = vrot.slane %v1848_v40, 1  ;;  %v143_v13 = vrot.slane %v1848_v40, 7 }
 0x108   :  { %v109_v52 = vpop.f32.mrf.mxu1 }
 0x109   :  { %v1879_v53 = vadd.f32 %v1606_v34, %v109_v52  ;;  %v1395_v34 = vld [vmem:[%s2783_s5 + $0x228] sm:$0xff]  ;;  %v1390_v52 = vld [vmem:[%s2783_s5 + $0x200] sm:$0xff] }
 0x10a   :  { %465 = vmatpush.msra.mxu1 %v1395_v34 }
 0x10b   :  { %169 = vrot.lane.b32.xlu0 %v1879_v53, %s1684_s28  ;;  %v155_v58 = vrot.slane %v1879_v53, 1  ;;  %v144_v12 = vrot.slane %v1879_v53, 7 }
 0x10c   :  { %466 = vmatpush.msra.mxu1 %v1394_v36  ;;  %v1410_v36 = vld [vmem:[%s2783_s5 + $0x288] sm:$0xff] }
 0x10d   :  { %v157_v62 = vsel %vm156_vm3, %v154_v57, %v155_v58  ;;  %v158_v8 = vsel %vm156_vm3, %v155_v58, %v154_v57  ;;  %v147_v15 = vsel %vm145_vm7, %v144_v12, %v143_v13  ;;  %v146_v20 = vsel %vm145_vm7, %v143_v13, %v144_v12  ;;  %v1386_v13 = vld [vmem:[%s2783_s5 + $0x1e0] sm:$0xff] }
 0x10e   :  { %v163_v1 = vsel %vm1890_vm4, 0.0, %v157_v62  ;;  %v164_v9 = vsel %vm1927_vm6, 0.0, %v158_v8  ;;  %v152_v17 = vsel %vm1946_vm8, 0.0, %v147_v15  ;;  %v153_v22 = vsel %vm1955_vm9, 0.0, %v146_v20  ;;  %467 = vmatpush.msra.mxu1 %v1393_v41  ;;  %v1413_v15 = vld [vmem:[%s2783_s5 + $0x2a0] sm:$0xff] }
 0x10f   :  { %1343 = vmatmul.msk.f32.vlgmr.msra.gmra.mxu3 %vm173_vm5, %v163_v1  ;;  %1370 = vmatmul.msk.f32.vlgmr.msrb.gmra.mxu1 %vm173_vm5, %v163_v1  ;;  %v1416_v1 = vld [vmem:[%s2783_s5 + $0x2b8] sm:$0xff] }
 0x110   :  { %468 = vmatpush.msra.mxu1 %v1392_v45  ;;  %508 = vmatpush.msrb.mxu2 %v1416_v1  ;;  %v1408_v45 = vld [vmem:[%s2783_s5 + $0x278] sm:$0xff]  ;;  %v1375_v1 = vld [vmem:[%s2783_s5 + $0x188] sm:$0xff] }
 0x112   :  { %469 = vmatpush.msra.mxu1 %v1391_v50  ;;  %509 = vmatpush.msrb.mxu2 %v1415_v4  ;;  %v1407_v50 = vld [vmem:[%s2783_s5 + $0x270] sm:$0xff] }
 0x114   :  { %470 = vmatpush.msra.mxu1 %v1390_v52  ;;  %510 = vmatpush.msrb.mxu2 %v1414_v10  ;;  %v1379_v52 = vld [vmem:[%s2783_s5 + $0x1a8] sm:$0xff] }
 0x116   :  { %511 = vmatpush.msrb.mxu2 %v1413_v15 }
 0x117   :  { %1344 = vmatmul.msk.f32.gmra.mxu3 %vm173_vm5, %v164_v9  ;;  %1371 = vmatmul.msk.f32.gmra.mxu1 %vm173_vm5, %v164_v9  ;;  %v1387_v9 = vld [vmem:[%s2783_s5 + $0x1e8] sm:$0xff] }
 0x118   :  { %434 = vmatpush.msrb.mxu3 %v1387_v9 }
 0x11a   :  { %435 = vmatpush.msrb.mxu3 %v1386_v13 }
 0x175   :  { %v168_v16 = vpop.permute.xlu0 %167 }
 0x176   :  { %v174_v18 = vsel %vm173_vm5, %v152_v17, %v168_v16 }
 0x177   :  { %226 = vmatmul.f32.vlgmr.msra.gmra.mxu2 %v174_v18  ;;  %302 = vmatmul.f32.vlgmr.msrb.gmra.mxu0 %v174_v18 }
 0x17d   :  { %v170_v21 = vpop.permute.xlu0 %169 }
 0x17e   :  { %v175_v23 = vsel %vm173_vm5, %v153_v22, %v170_v21 }
 0x17f   :  { %229 = vmatmul.f32.gmra.mxu2 %v175_v23  ;;  %305 = vmatmul.f32.gmra.mxu0 %v175_v23  ;;  %v1385_v23 = vld [vmem:[%s2783_s5 + $0x1d8] sm:$0xff] }
 0x180   :  { %436 = vmatpush.msrb.mxu3 %v1385_v23 }
 0x182   :  { %437 = vmatpush.msrb.mxu3 %v1384_v28 }
 0x184   :  { %438 = vmatpush.msrb.mxu3 %v1383_v35  ;;  %v1449_v35 = vld [vmem:[%s2783_s5 + $0x398] sm:$0xff] }
 0x18c   :  { %v326_v25 = vpop.f32.mrf.mxu1 }
 0x192   :  { %v250_v11 = vpop.f32.mrf.mxu3 }
 0x194   :  { %v329_v43 = vpop.f32.mrf.mxu1 }
 0x1f4   :  { %v303_v26 = vpop.f32.mrf.mxu0 }
 0x1f5   :  { %v304_v27 = vadd.f32 %v1607_v24, %v303_v26 }
 0x1f7   :  { %v327_v30 = vadd.f32 %v326_v25, %v304_v27 }
 0x1f9   :  { %v1372_v33 = vmul.f32 -1.442695, %v327_v30 }
 0x1fa   :  { %v227_v58 = vpop.f32.mrf.mxu2 }
 0x1fb   :  { %1618 = vpow2.f32 %v1372_v33  ;;  %v228_v5 = vadd.f32 %v1608_v61, %v227_v58  ;;  %v1405_v58 = vld [vmem:[%s2783_s5 + $0x260] sm:$0xff] }
 0x1fc   :  { %v306_v38 = vpop.f32.mrf.mxu0 }
 0x1fd   :  { %v307_v39 = vadd.f32 %v1607_v24, %v306_v38  ;;  %v251_v18 = vadd.f32 %v250_v11, %v228_v5  ;;  %v1412_v24 = vld [vmem:[%s2783_s5 + $0x298] sm:$0xff]  ;;  %v1409_v38 = vld [vmem:[%s2783_s5 + $0x280] sm:$0xff] }
 0x1fe   :  { %512 = vmatpush.msrb.mxu2 %v1412_v24  ;;  %v1374_v5 = vld [vmem:[%s2783_s5 + $0x180] sm:$0xff]  ;;  %v1453_v24 = vld [vmem:[%s2783_s5 + $0x3b8] sm:$0xff] }
 0x1ff   :  { %v330_v44 = vadd.f32 %v329_v43, %v307_v39  ;;  %v253_v39 = vpop.f32.mrf.mxu3 }
 0x200   :  { %513 = vmatpush.msrb.mxu2 %v1411_v29 }
 0x201   :  { %v1619_v48 = vpop.eup %1618  ;;  %v1373_v49 = vmul.f32 -1.442695, %v330_v44  ;;  %v1381_v44 = vld [vmem:[%s2783_s5 + $0x1b8] sm:$0xff] }
 0x202   :  { %v338_v54 = vadd.f32 1.0, %v1619_v48  ;;  %v230_v21 = vpop.f32.mrf.mxu2  ;;  %514 = vmatpush.msrb.mxu2 %v1410_v36  ;;  %v1476_v36 = vld [vmem:[%s2783_s5 + $0x458] sm:$0xff] }
 0x203   :  { %1620 = vpow2.f32 %v1373_v49  ;;  %v231_v30 = vadd.f32 %v1608_v61, %v230_v21  ;;  %v1380_v49 = vld [vmem:[%s2783_s5 + $0x1b0] sm:$0xff]  ;;  %v1404_v61 = vld [vmem:[%s2783_s5 + $0x258] sm:$0xff] }
 0x204   :  { %1622 = vrcp.f32 %v338_v54  ;;  %v351_v3 = vand.u32 2147483648, %v338_v54  ;;  %v349_v8 = vand.u32 2147483647, %v338_v54  ;;  %vm345_vm11 = vweird.f32 %v338_v54  ;;  %515 = vmatpush.msrb.mxu2 %v1409_v38  ;;  %v1448_v38 = vld [vmem:[%s2783_s5 + $0x390] sm:$0xff] }
 0x205   :  { %v254_v42 = vadd.f32 %v253_v39, %v231_v30  ;;  %v1451_v30 = vld [vmem:[%s2783_s5 + $0x3a8] sm:$0xff]  ;;  %v1475_v39 = vld [vmem:[%s2783_s5 + $0x450] sm:$0xff] }
 0x206   :  { %v352_v17 = vor.u32 1.1754944e-38, %v351_v3  ;;  %vm350_vm13 = vcmp.eq.f32.partialorder %v349_v8, 8.507059e+37  ;;  %516 = vmatpush.msrb.mxu2 %v1408_v45  ;;  %v1447_v45 = vld [vmem:[%s2783_s5 + $0x388] sm:$0xff] }
 0x208   :  { %517 = vmatpush.msrb.mxu2 %v1407_v50  ;;  %v1473_v50 = vld [vmem:[%s2783_s5 + $0x440] sm:$0xff] }
 0x209   :  { %v1621_v57 = vpop.eup %1620 }
 0x20a   :  { %v1623_v59 = vpop.eup %1622  ;;  %v2015_v60 = vadd.f32 1.0, %v1621_v57 }
 0x20b   :  { %v341_v62 = vmul.f32 %v1623_v59, %v338_v54  ;;  %vm346_vm10 = vweird.f32 %v1623_v59  ;;  %v1406_v54 = vld [vmem:[%s2783_s5 + $0x268] sm:$0xff] }
 0x20c   :  { %1624 = vrcp.f32 %v2015_v60  ;;  %vm347_vm12 = vmor %vm345_vm11, %vm346_vm10  ;;  %v366_v31 = vand.u32 2147483648, %v2015_v60  ;;  %v364_v34 = vand.u32 2147483647, %v2015_v60  ;;  %vm360_vm15 = vweird.f32 %v2015_v60  ;;  %518 = vmatpush.msrb.mxu2 %v1406_v54 }
 0x20d   :  { %v342_v63 = vsub.f32 1.0, %v341_v62 }
 0x20e   :  { %v367_v41 = vor.u32 1.1754944e-38, %v366_v31  ;;  %vm365_vm1 = vcmp.eq.f32.partialorder %v364_v34, 8.507059e+37  ;;  %519 = vmatpush.msrb.mxu2 %v1405_v58  ;;  %v1478_v31 = vld [vmem:[%s2783_s5 + $0x468] sm:$0xff]  ;;  %v1477_v34 = vld [vmem:[%s2783_s5 + $0x460] sm:$0xff] }
 0x20f   :  { %v343_v6 = vmul.f32 %v1623_v59, %v342_v63  ;;  %v1376_v63 = vld [vmem:[%s2783_s5 + $0x190] sm:$0xff] }
 0x210   :  { %520 = vmatpush.msrb.mxu2 %v1404_v61  ;;  %v1472_v61 = vld [vmem:[%s2783_s5 + $0x438] sm:$0xff] }
 0x211   :  { %v344_v12 = vadd.f32 %v1623_v59, %v343_v6  ;;  %v1401_v6 = vld [vmem:[%s2783_s5 + $0x240] sm:$0xff]  ;;  %730 = vmatpush.msrb.mxu0 %v1472_v61  ;;  %v1431_v61 = vld [vmem:[%s2783_s5 + $0x308] sm:$0xff] }
 0x212   :  { %v1625_v16 = vpop.eup %1624  ;;  %521 = vmatpush.msrb.mxu2 %v1403_v0  ;;  %v1471_v0 = vld [vmem:[%s2783_s5 + $0x430] sm:$0xff] }
 0x213   :  { %v348_v20 = vsel %vm347_vm12, %v1623_v59, %v344_v12  ;;  %v356_v22 = vmul.f32 %v1625_v16, %v2015_v60  ;;  %vm361_vm14 = vweird.f32 %v1625_v16  ;;  %v1377_v60 = vld [vmem:[%s2783_s5 + $0x198] sm:$0xff]  ;;  %731 = vmatpush.msrb.mxu0 %v1471_v0 }
 0x214   :  { %v353_v25 = vsel %vm350_vm13, %v352_v17, %v348_v20  ;;  %vm362_vm0 = vmor %vm360_vm15, %vm361_vm14  ;;  %522 = vmatpush.msrb.mxu2 %v1402_v2  ;;  %v1610_v20 = vld [vmem:[%s2784_s6 + $0x3] ss:$0 sm:$0xff] }
 0x215   :  { %v370_v26 = vmul.f32 %v353_v25, %v251_v18  ;;  %v357_v27 = vsub.f32 1.0, %v356_v22  ;;  %v1480_v25 = vld [vmem:[%s2783_s5 + $0x478] sm:$0xff] }
 0x216   :  { %523 = vmatpush.msrb.mxu2 %v1401_v6 }
 0x217   :  { %v2060_v32 = vadd.f32 %v370_v26, %v1848_v40  ;;  %v358_v33 = vmul.f32 %v1625_v16, %v357_v27  ;;  %v1382_v40 = vld [vmem:[%s2783_s5 + $0x1c0] sm:$0xff]  ;;  %v1452_v26 = vld [vmem:[%s2783_s5 + $0x3b0] sm:$0xff] }
 0x218   :  { %439 = vmatpush.msrb.mxu3 %v1382_v40  ;;  %761 = vmatpush.msra.mxu2 %v1480_v25  ;;  %v1479_v27 = vld [vmem:[%s2783_s5 + $0x470] sm:$0xff] }
 0x219   :  { %v359_v37 = vadd.f32 %v1625_v16, %v358_v33  ;;  %388 = vrot.lane.b32.xlu1 %v2060_v32, %s1684_s28  ;;  %v380_v55 = vrot.slane %v2060_v32, 1  ;;  %v374_v9 = vrot.slane %v2060_v32, 7  ;;  %v1450_v33 = vld [vmem:[%s2783_s5 + $0x3a0] sm:$0xff]  ;;  %v1467_v25 = vld [vmem:[%s2783_s5 + $0x410] sm:$0xff] }
 0x21a   :  { %440 = vmatpush.msrb.mxu3 %v1381_v44  ;;  %762 = vmatpush.msra.mxu2 %v1479_v27 }
 0x21b   :  { %v363_v43 = vsel %vm362_vm0, %v1625_v16, %v359_v37 }
 0x21c   :  { %v368_v47 = vsel %vm365_vm1, %v367_v41, %v363_v43  ;;  %441 = vmatpush.msrb.mxu3 %v1380_v49  ;;  %763 = vmatpush.msra.mxu2 %v1478_v31  ;;  %v1439_v31 = vld [vmem:[%s2783_s5 + $0x348] sm:$0xff] }
 0x21d   :  { %v371_v48 = vmul.f32 %v368_v47, %v254_v42  ;;  %v1474_v47 = vld [vmem:[%s2783_s5 + $0x448] sm:$0xff] }
 0x21e   :  { %442 = vmatpush.msrb.mxu3 %v1379_v52  ;;  %764 = vmatpush.msra.mxu2 %v1477_v34 }
 0x21f   :  { %v2091_v51 = vadd.f32 %v371_v48, %v1879_v53  ;;  %v1378_v53 = vld [vmem:[%s2783_s5 + $0x1a0] sm:$0xff] }
 0x220   :  { %443 = vmatpush.msrb.mxu3 %v1378_v53  ;;  %765 = vmatpush.msra.mxu2 %v1476_v36  ;;  %v1446_v48 = vld [vmem:[%s2783_s5 + $0x380] sm:$0xff] }
 0x221   :  { %390 = vrot.lane.b32.xlu1 %v2091_v51, %s1684_s28  ;;  %v381_v57 = vrot.slane %v2091_v51, 1  ;;  %v375_v8 = vrot.slane %v2091_v51, 7  ;;  %v1609_v53 = vld [vmem:[%s2784_s6 + $0x2] ss:$0 sm:$0xff] }
 0x222   :  { %444 = vmatpush.msrb.mxu3 %v1377_v60  ;;  %766 = vmatpush.msra.mxu2 %v1475_v39  ;;  %v1445_v60 = vld [vmem:[%s2783_s5 + $0x378] sm:$0xff] }
 0x223   :  { %v382_v59 = vsel %vm156_vm3, %v380_v55, %v381_v57  ;;  %v383_v3 = vsel %vm156_vm3, %v381_v57, %v380_v55  ;;  %v377_v10 = vsel %vm145_vm7, %v375_v8, %v374_v9  ;;  %v376_v15 = vsel %vm145_vm7, %v374_v9, %v375_v8  ;;  %654 = vmatpush.msrb.mxu1 %v1445_v60  ;;  %v1442_v9 = vld [vmem:[%s2783_s5 + $0x360] sm:$0xff]  ;;  %v1437_v39 = vld [vmem:[%s2783_s5 + $0x338] sm:$0xff]  ;;  %v1459_v60 = vld [vmem:[%s2783_s5 + $0x3d0] sm:$0xff] }
 0x224   :  { %v384_v62 = vsel %vm1890_vm4, 0.0, %v382_v59  ;;  %445 = vmatpush.msrb.mxu3 %v1376_v63  ;;  %v385_v4 = vsel %vm1927_vm6, 0.0, %v383_v3  ;;  %v378_v12 = vsel %vm1946_vm8, 0.0, %v377_v10  ;;  %v379_v17 = vsel %vm1955_vm9, 0.0, %v376_v15  ;;  %767 = vmatpush.msra.mxu2 %v1474_v47  ;;  %v1469_v10 = vld [vmem:[%s2783_s5 + $0x420] sm:$0xff] }
 0x225   :  { %1399 = vmatmul.msk.f32.vlgmr.msra.gmra.mxu1 %vm173_vm5, %v384_v62  ;;  %1426 = vmatmul.msk.f32.vlgmr.msra.gmra.mxu0 %vm173_vm5, %v384_v62  ;;  %v1444_v62 = vld [vmem:[%s2783_s5 + $0x370] sm:$0xff] }
 0x226   :  { %446 = vmatpush.msrb.mxu3 %v1375_v1  ;;  %768 = vmatpush.msra.mxu2 %v1473_v50 }
 0x227   :  { %655 = vmatpush.msrb.mxu1 %v1444_v62  ;;  %v1458_v62 = vld [vmem:[%s2783_s5 + $0x3c8] sm:$0xff] }
 0x228   :  { %447 = vmatpush.msrb.mxu3 %v1374_v5  ;;  %v1470_v5 = vld [vmem:[%s2783_s5 + $0x428] sm:$0xff] }
 0x229   :  { %732 = vmatpush.msrb.mxu0 %v1470_v5 }
 0x22a   :  { %685 = vmatpush.msra.mxu3 %v1453_v24  ;;  %v1440_v24 = vld [vmem:[%s2783_s5 + $0x350] sm:$0xff] }
 0x22b   :  { %733 = vmatpush.msrb.mxu0 %v1469_v10 }
 0x22c   :  { %686 = vmatpush.msra.mxu3 %v1452_v26 }
 0x22d   :  { %1400 = vmatmul.msk.f32.gmra.mxu1 %vm173_vm5, %v385_v4  ;;  %1427 = vmatmul.msk.f32.gmra.mxu0 %vm173_vm5, %v385_v4  ;;  %v1443_v4 = vld [vmem:[%s2783_s5 + $0x368] sm:$0xff] }
 0x22e   :  { %687 = vmatpush.msra.mxu3 %v1451_v30  ;;  %656 = vmatpush.msrb.mxu1 %v1443_v4 }
 0x230   :  { %688 = vmatpush.msra.mxu3 %v1450_v33  ;;  %657 = vmatpush.msrb.mxu1 %v1442_v9  ;;  %v1466_v33 = vld [vmem:[%s2783_s5 + $0x408] sm:$0xff] }
 0x232   :  { %689 = vmatpush.msra.mxu3 %v1449_v35  ;;  %v1465_v35 = vld [vmem:[%s2783_s5 + $0x400] sm:$0xff] }
 0x234   :  { %690 = vmatpush.msra.mxu3 %v1448_v38 }
 0x236   :  { %691 = vmatpush.msra.mxu3 %v1447_v45  ;;  %v1463_v45 = vld [vmem:[%s2783_s5 + $0x3f0] sm:$0xff] }
 0x238   :  { %692 = vmatpush.msra.mxu3 %v1446_v48  ;;  %v1435_v48 = vld [vmem:[%s2783_s5 + $0x328] sm:$0xff] }
 0x28b   :  { %v389_v11 = vpop.permute.xlu1 %388 }
 0x28c   :  { %v394_v13 = vsel %vm173_vm5, %v378_v12, %v389_v11 }
 0x28d   :  { %448 = vmatmul.f32.vlgmr.msrb.gmra.mxu3 %v394_v13  ;;  %524 = vmatmul.f32.vlgmr.msrb.gmra.mxu2 %v394_v13 }
 0x293   :  { %v391_v16 = vpop.permute.xlu1 %390 }
 0x294   :  { %v395_v18 = vsel %vm173_vm5, %v379_v17, %v391_v16 }
 0x295   :  { %451 = vmatmul.f32.gmra.mxu3 %v395_v18  ;;  %527 = vmatmul.f32.gmra.mxu2 %v395_v18  ;;  %v1441_v18 = vld [vmem:[%s2783_s5 + $0x358] sm:$0xff] }
 0x296   :  { %658 = vmatpush.msrb.mxu1 %v1441_v18 }
 0x298   :  { %659 = vmatpush.msrb.mxu1 %v1440_v24 }
 0x29a   :  { %660 = vmatpush.msrb.mxu1 %v1439_v31  ;;  %v1505_v31 = vld [vmem:[%s2783_s5 + $0x518] sm:$0xff] }
 0x2a2   :  { %v548_v21 = vpop.f32.mrf.mxu0  ;;  %v472_v6 = vpop.f32.mrf.mxu1 }
 0x2aa   :  { %v551_v41 = vpop.f32.mrf.mxu0  ;;  %v475_v36 = vpop.f32.mrf.mxu1 }
 0x310   :  { %v525_v22 = vpop.f32.mrf.mxu2  ;;  %v449_v54 = vpop.f32.mrf.mxu3 }
 0x311   :  { %v526_v23 = vadd.f32 %v1610_v20, %v525_v22  ;;  %v450_v1 = vadd.f32 %v1609_v53, %v449_v54  ;;  %v1461_v54 = vld [vmem:[%s2783_s5 + $0x3e0] sm:$0xff] }
 0x313   :  { %v549_v28 = vadd.f32 %v548_v21, %v526_v23  ;;  %v473_v13 = vadd.f32 %v472_v6, %v450_v1  ;;  %v1430_v1 = vld [vmem:[%s2783_s5 + $0x300] sm:$0xff] }
 0x315   :  { %v1428_v29 = vmul.f32 -1.442695, %v549_v28 }
 0x317   :  { %1626 = vpow2.f32 %v1428_v29 }
 0x318   :  { %v528_v37 = vpop.f32.mrf.mxu2  ;;  %v452_v15 = vpop.f32.mrf.mxu3 }
 0x319   :  { %v529_v40 = vadd.f32 %v1610_v20, %v528_v37  ;;  %v1468_v20 = vld [vmem:[%s2783_s5 + $0x418] sm:$0xff]  ;;  %v453_v26 = vadd.f32 %v1609_v53, %v452_v15  ;;  %v1612_v15 = vld [vmem:[%s2784_s6 + $0x5] ss:$0 sm:$0xff] }
 0x31a   :  { %734 = vmatpush.msrb.mxu0 %v1468_v20  ;;  %v1460_v53 = vld [vmem:[%s2783_s5 + $0x3d8] sm:$0xff] }
 0x31b   :  { %v552_v42 = vadd.f32 %v551_v41, %v529_v40  ;;  %v476_v40 = vadd.f32 %v475_v36, %v453_v26  ;;  %v1464_v41 = vld [vmem:[%s2783_s5 + $0x3f8] sm:$0xff]  ;;  %v1507_v26 = vld [vmem:[%s2783_s5 + $0x528] sm:$0xff]  ;;  %v1531_v36 = vld [vmem:[%s2783_s5 + $0x5d0] sm:$0xff] }
 0x31c   :  { %735 = vmatpush.msrb.mxu0 %v1467_v25  ;;  %v1509_v20 = vld [vmem:[%s2783_s5 + $0x538] sm:$0xff] }
 0x31d   :  { %v1627_v43 = vpop.eup %1626  ;;  %v1429_v44 = vmul.f32 -1.442695, %v552_v42 }
 0x31e   :  { %v560_v49 = vadd.f32 1.0, %v1627_v43  ;;  %736 = vmatpush.msrb.mxu0 %v1466_v33  ;;  %v1532_v33 = vld [vmem:[%s2783_s5 + $0x5d8] sm:$0xff] }
 0x31f   :  { %1628 = vpow2.f32 %v1429_v44  ;;  %v1436_v44 = vld [vmem:[%s2783_s5 + $0x330] sm:$0xff] }
 0x320   :  { %1630 = vrcp.f32 %v560_v49  ;;  %v573_v63 = vand.u32 2147483648, %v560_v49  ;;  %v571_v3 = vand.u32 2147483647, %v560_v49  ;;  %vm567_vm11 = vweird.f32 %v560_v49  ;;  %737 = vmatpush.msrb.mxu0 %v1465_v35  ;;  %v1504_v35 = vld [vmem:[%s2783_s5 + $0x510] sm:$0xff] }
 0x322   :  { %v574_v12 = vor.u32 1.1754944e-38, %v573_v63  ;;  %vm572_vm13 = vcmp.eq.f32.partialorder %v571_v3, 8.507059e+37  ;;  %738 = vmatpush.msrb.mxu0 %v1464_v41  ;;  %v1503_v41 = vld [vmem:[%s2783_s5 + $0x508] sm:$0xff] }
 0x324   :  { %739 = vmatpush.msrb.mxu0 %v1463_v45  ;;  %v1529_v45 = vld [vmem:[%s2783_s5 + $0x5c0] sm:$0xff] }
 0x325   :  { %v1629_v52 = vpop.eup %1628 }
 0x326   :  { %v1631_v55 = vpop.eup %1630  ;;  %v2208_v57 = vadd.f32 1.0, %v1629_v52 }
 0x327   :  { %v563_v58 = vmul.f32 %v1631_v55, %v560_v49  ;;  %vm568_vm10 = vweird.f32 %v1631_v55  ;;  %v1462_v49 = vld [vmem:[%s2783_s5 + $0x3e8] sm:$0xff] }
 0x328   :  { %1632 = vrcp.f32 %v2208_v57  ;;  %vm569_vm12 = vmor %vm567_vm11, %vm568_vm10  ;;  %v588_v27 = vand.u32 2147483648, %v2208_v57  ;;  %v586_v30 = vand.u32 2147483647, %v2208_v57  ;;  %vm582_vm15 = vweird.f32 %v2208_v57  ;;  %740 = vmatpush.msrb.mxu0 %v1462_v49 }
 0x329   :  { %v564_v59 = vsub.f32 1.0, %v563_v58 }
 0x32a   :  { %v589_v37 = vor.u32 1.1754944e-38, %v588_v27  ;;  %vm587_vm1 = vcmp.eq.f32.partialorder %v586_v30, 8.507059e+37  ;;  %741 = vmatpush.msrb.mxu0 %v1461_v54  ;;  %v1534_v27 = vld [vmem:[%s2783_s5 + $0x5e8] sm:$0xff]  ;;  %v1533_v30 = vld [vmem:[%s2783_s5 + $0x5e0] sm:$0xff] }
 0x32b   :  { %v565_v2 = vmul.f32 %v1631_v55, %v564_v59  ;;  %v1432_v59 = vld [vmem:[%s2783_s5 + $0x310] sm:$0xff] }
 0x32c   :  { %742 = vmatpush.msrb.mxu0 %v1460_v53  ;;  %v1528_v53 = vld [vmem:[%s2783_s5 + $0x5b8] sm:$0xff] }
 0x32d   :  { %v566_v8 = vadd.f32 %v1631_v55, %v565_v2  ;;  %v1457_v2 = vld [vmem:[%s2783_s5 + $0x3c0] sm:$0xff]  ;;  %952 = vmatpush.msrb.mxu2 %v1528_v53  ;;  %v1487_v53 = vld [vmem:[%s2783_s5 + $0x488] sm:$0xff] }
 0x32e   :  { %v1633_v11 = vpop.eup %1632  ;;  %743 = vmatpush.msrb.mxu0 %v1459_v60  ;;  %v1527_v60 = vld [vmem:[%s2783_s5 + $0x5b0] sm:$0xff] }
 0x32f   :  { %v578_v16 = vmul.f32 %v1633_v11, %v2208_v57  ;;  %v570_v17 = vsel %vm569_vm12, %v1631_v55, %v566_v8  ;;  %vm583_vm14 = vweird.f32 %v1633_v11  ;;  %v1433_v57 = vld [vmem:[%s2783_s5 + $0x318] sm:$0xff]  ;;  %953 = vmatpush.msrb.mxu2 %v1527_v60 }
 0x330   :  { %v575_v21 = vsel %vm572_vm13, %v574_v12, %v570_v17  ;;  %vm584_vm0 = vmor %vm582_vm15, %vm583_vm14  ;;  %744 = vmatpush.msrb.mxu0 %v1458_v62 }
 0x331   :  { %v579_v22 = vsub.f32 1.0, %v578_v16  ;;  %v592_v23 = vmul.f32 %v575_v21, %v473_v13  ;;  %v1536_v21 = vld [vmem:[%s2783_s5 + $0x5f8] sm:$0xff] }
 0x332   :  { %745 = vmatpush.msrb.mxu0 %v1457_v2 }
 0x333   :  { %v2253_v28 = vadd.f32 %v592_v23, %v2060_v32  ;;  %v580_v29 = vmul.f32 %v1633_v11, %v579_v22  ;;  %v1438_v32 = vld [vmem:[%s2783_s5 + $0x340] sm:$0xff]  ;;  %v1508_v22 = vld [vmem:[%s2783_s5 + $0x530] sm:$0xff] }
 0x334   :  { %661 = vmatpush.msrb.mxu1 %v1438_v32  ;;  %983 = vmatpush.msra.mxu0 %v1536_v21  ;;  %v1535_v23 = vld [vmem:[%s2783_s5 + $0x5f0] sm:$0xff] }
 0x335   :  { %610 = vrot.lane.b32.xlu2 %v2253_v28, %s1684_s28  ;;  %v581_v34 = vadd.f32 %v1633_v11, %v580_v29  ;;  %v602_v50 = vrot.slane %v2253_v28, 1  ;;  %v596_v4 = vrot.slane %v2253_v28, 7  ;;  %v1506_v29 = vld [vmem:[%s2783_s5 + $0x520] sm:$0xff]  ;;  %v1523_v21 = vld [vmem:[%s2783_s5 + $0x590] sm:$0xff] }
 0x336   :  { %662 = vmatpush.msrb.mxu1 %v1437_v39  ;;  %984 = vmatpush.msra.mxu0 %v1535_v23 }
 0x337   :  { %v585_v38 = vsel %vm584_vm0, %v1633_v11, %v581_v34 }
 0x338   :  { %v590_v42 = vsel %vm587_vm1, %v589_v37, %v585_v38  ;;  %663 = vmatpush.msrb.mxu1 %v1436_v44  ;;  %985 = vmatpush.msra.mxu0 %v1534_v27  ;;  %v1495_v27 = vld [vmem:[%s2783_s5 + $0x4c8] sm:$0xff] }
 0x339   :  { %v593_v43 = vmul.f32 %v590_v42, %v476_v40  ;;  %v1530_v42 = vld [vmem:[%s2783_s5 + $0x5c8] sm:$0xff] }
 0x33a   :  { %664 = vmatpush.msrb.mxu1 %v1435_v48  ;;  %986 = vmatpush.msra.mxu0 %v1533_v30 }
 0x33b   :  { %v2284_v47 = vadd.f32 %v593_v43, %v2091_v51  ;;  %v1434_v51 = vld [vmem:[%s2783_s5 + $0x320] sm:$0xff] }
 0x33c   :  { %665 = vmatpush.msrb.mxu1 %v1434_v51  ;;  %987 = vmatpush.msra.mxu0 %v1532_v33  ;;  %v1502_v43 = vld [vmem:[%s2783_s5 + $0x500] sm:$0xff] }
 0x33d   :  { %612 = vrot.lane.b32.xlu2 %v2284_v47, %s1684_s28  ;;  %v603_v52 = vrot.slane %v2284_v47, 1  ;;  %v597_v3 = vrot.slane %v2284_v47, 7  ;;  %v1611_v51 = vld [vmem:[%s2784_s6 + $0x4] ss:$0 sm:$0xff] }
 0x33e   :  { %666 = vmatpush.msrb.mxu1 %v1433_v57  ;;  %988 = vmatpush.msra.mxu0 %v1531_v36  ;;  %v1501_v57 = vld [vmem:[%s2783_s5 + $0x4f8] sm:$0xff] }
 0x33f   :  { %v604_v55 = vsel %vm156_vm3, %v602_v50, %v603_v52  ;;  %v605_v63 = vsel %vm156_vm3, %v603_v52, %v602_v50  ;;  %v599_v5 = vsel %vm145_vm7, %v597_v3, %v596_v4  ;;  %v598_v10 = vsel %vm145_vm7, %v596_v4, %v597_v3  ;;  %876 = vmatpush.msrb.mxu3 %v1501_v57  ;;  %v1498_v4 = vld [vmem:[%s2783_s5 + $0x4e0] sm:$0xff]  ;;  %v1493_v36 = vld [vmem:[%s2783_s5 + $0x4b8] sm:$0xff]  ;;  %v1515_v57 = vld [vmem:[%s2783_s5 + $0x550] sm:$0xff] }
 0x340   :  { %v606_v58 = vsel %vm1890_vm4, 0.0, %v604_v55  ;;  %667 = vmatpush.msrb.mxu1 %v1432_v59  ;;  %v607_v0 = vsel %vm1927_vm6, 0.0, %v605_v63  ;;  %v600_v8 = vsel %vm1946_vm8, 0.0, %v599_v5  ;;  %v601_v12 = vsel %vm1955_vm9, 0.0, %v598_v10  ;;  %989 = vmatpush.msra.mxu0 %v1530_v42  ;;  %v1525_v5 = vld [vmem:[%s2783_s5 + $0x5a0] sm:$0xff] }
 0x341   :  { %1455 = vmatmul.msk.f32.vlgmr.msra.gmra.mxu3 %vm173_vm5, %v606_v58  ;;  %1482 = vmatmul.msk.f32.vlgmr.msra.gmra.mxu2 %vm173_vm5, %v606_v58  ;;  %v1500_v58 = vld [vmem:[%s2783_s5 + $0x4f0] sm:$0xff] }
 0x342   :  { %668 = vmatpush.msrb.mxu1 %v1431_v61  ;;  %990 = vmatpush.msra.mxu0 %v1529_v45 }
 0x343   :  { %877 = vmatpush.msrb.mxu3 %v1500_v58  ;;  %v1514_v58 = vld [vmem:[%s2783_s5 + $0x548] sm:$0xff] }
 0x344   :  { %669 = vmatpush.msrb.mxu1 %v1430_v1  ;;  %v1526_v1 = vld [vmem:[%s2783_s5 + $0x5a8] sm:$0xff] }
 0x345   :  { %954 = vmatpush.msrb.mxu2 %v1526_v1 }
 0x346   :  { %907 = vmatpush.msra.mxu1 %v1509_v20  ;;  %v1496_v20 = vld [vmem:[%s2783_s5 + $0x4d0] sm:$0xff] }
 0x347   :  { %955 = vmatpush.msrb.mxu2 %v1525_v5 }
 0x348   :  { %908 = vmatpush.msra.mxu1 %v1508_v22 }
 0x349   :  { %1456 = vmatmul.msk.f32.gmra.mxu3 %vm173_vm5, %v607_v0  ;;  %1483 = vmatmul.msk.f32.gmra.mxu2 %vm173_vm5, %v607_v0  ;;  %v1499_v0 = vld [vmem:[%s2783_s5 + $0x4e8] sm:$0xff] }
 0x34a   :  { %909 = vmatpush.msra.mxu1 %v1507_v26  ;;  %878 = vmatpush.msrb.mxu3 %v1499_v0 }
 0x34c   :  { %910 = vmatpush.msra.mxu1 %v1506_v29  ;;  %879 = vmatpush.msrb.mxu3 %v1498_v4  ;;  %v1522_v29 = vld [vmem:[%s2783_s5 + $0x588] sm:$0xff] }
 0x34e   :  { %911 = vmatpush.msra.mxu1 %v1505_v31  ;;  %v1521_v31 = vld [vmem:[%s2783_s5 + $0x580] sm:$0xff] }
 0x350   :  { %912 = vmatpush.msra.mxu1 %v1504_v35 }
 0x352   :  { %913 = vmatpush.msra.mxu1 %v1503_v41  ;;  %v1519_v41 = vld [vmem:[%s2783_s5 + $0x570] sm:$0xff] }
 0x354   :  { %914 = vmatpush.msra.mxu1 %v1502_v43  ;;  %v1491_v43 = vld [vmem:[%s2783_s5 + $0x4a8] sm:$0xff] }
 0x38f   :  { %v611_v6 = vpop.permute.xlu2 %610 }
 0x390   :  { %v616_v9 = vsel %vm173_vm5, %v600_v8, %v611_v6 }
 0x391   :  { %670 = vmatmul.f32.vlgmr.msrb.gmra.mxu1 %v616_v9  ;;  %746 = vmatmul.f32.vlgmr.msrb.gmra.mxu0 %v616_v9 }
 0x397   :  { %v613_v11 = vpop.permute.xlu2 %612 }
 0x398   :  { %v617_v13 = vsel %vm173_vm5, %v601_v12, %v613_v11 }
 0x399   :  { %673 = vmatmul.f32.gmra.mxu1 %v617_v13  ;;  %749 = vmatmul.f32.gmra.mxu0 %v617_v13  ;;  %v1497_v13 = vld [vmem:[%s2783_s5 + $0x4d8] sm:$0xff] }
 0x39a   :  { %880 = vmatpush.msrb.mxu3 %v1497_v13 }
 0x39c   :  { %881 = vmatpush.msrb.mxu3 %v1496_v20 }
 0x39e   :  { %882 = vmatpush.msrb.mxu3 %v1495_v27  ;;  %v1561_v27 = vld [vmem:[%s2783_s5 + $0x698] sm:$0xff] }
 0x3c4   :  { %v770_v16 = vpop.f32.mrf.mxu2  ;;  %v694_v2 = vpop.f32.mrf.mxu3 }
 0x3cc   :  { %v773_v37 = vpop.f32.mrf.mxu2  ;;  %v697_v33 = vpop.f32.mrf.mxu3 }
 0x40e   :  { %v747_v17 = vpop.f32.mrf.mxu0  ;;  %v671_v49 = vpop.f32.mrf.mxu1 }
 0x40f   :  { %v748_v18 = vadd.f32 %v1612_v15, %v747_v17  ;;  %v672_v61 = vadd.f32 %v1611_v51, %v671_v49  ;;  %v1517_v49 = vld [vmem:[%s2783_s5 + $0x560] sm:$0xff] }
 0x411   :  { %v771_v24 = vadd.f32 %v770_v16, %v748_v18  ;;  %v695_v9 = vadd.f32 %v694_v2, %v672_v61  ;;  %v1486_v61 = vld [vmem:[%s2783_s5 + $0x480] sm:$0xff] }
 0x413   :  { %v1484_v25 = vmul.f32 -1.442695, %v771_v24 }
 0x415   :  { %1634 = vpow2.f32 %v1484_v25 }
 0x416   :  { %v750_v34 = vpop.f32.mrf.mxu0  ;;  %v674_v10 = vpop.f32.mrf.mxu1 }
 0x417   :  { %v751_v32 = vadd.f32 %v1612_v15, %v750_v34  ;;  %v1524_v15 = vld [vmem:[%s2783_s5 + $0x598] sm:$0xff]  ;;  %v675_v22 = vadd.f32 %v1611_v51, %v674_v10  ;;  %v1614_v10 = vld [vmem:[%s2784_s6 + $0x7] ss:$0 sm:$0xff] }
 0x418   :  { %956 = vmatpush.msrb.mxu2 %v1524_v15  ;;  %v1516_v51 = vld [vmem:[%s2783_s5 + $0x558] sm:$0xff] }
 0x419   :  { %v774_v40 = vadd.f32 %v773_v37, %v751_v32  ;;  %v698_v32 = vadd.f32 %v697_v33, %v675_v22  ;;  %v1520_v37 = vld [vmem:[%s2783_s5 + $0x578] sm:$0xff]  ;;  %v1563_v22 = vld [vmem:[%s2783_s5 + $0x6a8] sm:$0xff]  ;;  %v1587_v33 = vld [vmem:[%s2783_s5 + $0x750] sm:$0xff] }
 0x41a   :  { %957 = vmatpush.msrb.mxu2 %v1523_v21  ;;  %v1565_v15 = vld [vmem:[%s2783_s5 + $0x6b8] sm:$0xff] }
 0x41b   :  { %v1635_v38 = vpop.eup %1634  ;;  %v1485_v39 = vmul.f32 -1.442695, %v774_v40 }
 0x41c   :  { %v782_v44 = vadd.f32 1.0, %v1635_v38  ;;  %958 = vmatpush.msrb.mxu2 %v1522_v29  ;;  %v1588_v29 = vld [vmem:[%s2783_s5 + $0x758] sm:$0xff] }
 0x41d   :  { %1636 = vpow2.f32 %v1485_v39  ;;  %v1492_v39 = vld [vmem:[%s2783_s5 + $0x4b0] sm:$0xff] }
 0x41e   :  { %1638 = vrcp.f32 %v782_v44  ;;  %v795_v59 = vand.u32 2147483648, %v782_v44  ;;  %v793_v63 = vand.u32 2147483647, %v782_v44  ;;  %vm789_vm11 = vweird.f32 %v782_v44  ;;  %959 = vmatpush.msrb.mxu2 %v1521_v31  ;;  %v1560_v31 = vld [vmem:[%s2783_s5 + $0x690] sm:$0xff] }
 0x420   :  { %v796_v8 = vor.u32 1.1754944e-38, %v795_v59  ;;  %vm794_vm13 = vcmp.eq.f32.partialorder %v793_v63, 8.507059e+37  ;;  %960 = vmatpush.msrb.mxu2 %v1520_v37  ;;  %v1559_v37 = vld [vmem:[%s2783_s5 + $0x688] sm:$0xff] }
 0x422   :  { %961 = vmatpush.msrb.mxu2 %v1519_v41  ;;  %v1585_v41 = vld [vmem:[%s2783_s5 + $0x740] sm:$0xff] }
 0x423   :  { %v1637_v48 = vpop.eup %1636 }
 0x424   :  { %v1639_v50 = vpop.eup %1638  ;;  %v2401_v52 = vadd.f32 1.0, %v1637_v48 }
 0x425   :  { %v785_v54 = vmul.f32 %v1639_v50, %v782_v44  ;;  %vm790_vm10 = vweird.f32 %v1639_v50  ;;  %v1518_v44 = vld [vmem:[%s2783_s5 + $0x568] sm:$0xff] }
 0x426   :  { %1640 = vrcp.f32 %v2401_v52  ;;  %vm791_vm12 = vmor %vm789_vm11, %vm790_vm10  ;;  %v810_v23 = vand.u32 2147483648, %v2401_v52  ;;  %v808_v26 = vand.u32 2147483647, %v2401_v52  ;;  %vm804_vm15 = vweird.f32 %v2401_v52  ;;  %962 = vmatpush.msrb.mxu2 %v1518_v44 }
 0x427   :  { %v786_v55 = vsub.f32 1.0, %v785_v54 }
 0x428   :  { %v811_v34 = vor.u32 1.1754944e-38, %v810_v23  ;;  %vm809_vm1 = vcmp.eq.f32.partialorder %v808_v26, 8.507059e+37  ;;  %963 = vmatpush.msrb.mxu2 %v1517_v49  ;;  %v1590_v23 = vld [vmem:[%s2783_s5 + $0x768] sm:$0xff]  ;;  %v1589_v26 = vld [vmem:[%s2783_s5 + $0x760] sm:$0xff] }
 0x429   :  { %v787_v62 = vmul.f32 %v1639_v50, %v786_v55  ;;  %v1488_v55 = vld [vmem:[%s2783_s5 + $0x490] sm:$0xff] }
 0x42a   :  { %964 = vmatpush.msrb.mxu2 %v1516_v51  ;;  %v1584_v51 = vld [vmem:[%s2783_s5 + $0x738] sm:$0xff] }
 0x42b   :  { %v788_v3 = vadd.f32 %v1639_v50, %v787_v62  ;;  %v1513_v62 = vld [vmem:[%s2783_s5 + $0x540] sm:$0xff]  ;;  %1174 = vmatpush.msrb.mxu0 %v1584_v51  ;;  %v1570_v51 = vld [vmem:[%s2783_s5 + $0x6c8] sm:$0xff] }
 0x42c   :  { %v1641_v6 = vpop.eup %1640  ;;  %965 = vmatpush.msrb.mxu2 %v1515_v57  ;;  %v1583_v57 = vld [vmem:[%s2783_s5 + $0x730] sm:$0xff] }
 0x42d   :  { %v800_v11 = vmul.f32 %v1641_v6, %v2401_v52  ;;  %v792_v12 = vsel %vm791_vm12, %v1639_v50, %v788_v3  ;;  %vm805_vm14 = vweird.f32 %v1641_v6  ;;  %v1489_v52 = vld [vmem:[%s2783_s5 + $0x498] sm:$0xff]  ;;  %1175 = vmatpush.msrb.mxu0 %v1583_v57  ;;  %v1542_v57 = vld [vmem:[%s2783_s5 + $0x600] sm:$0xff] }
 0x42e   :  { %v797_v16 = vsel %vm794_vm13, %v796_v8, %v792_v12  ;;  %vm806_vm0 = vmor %vm804_vm15, %vm805_vm14  ;;  %966 = vmatpush.msrb.mxu2 %v1514_v58 }
 0x42f   :  { %v801_v17 = vsub.f32 1.0, %v800_v11  ;;  %v814_v18 = vmul.f32 %v797_v16, %v695_v9  ;;  %v1592_v16 = vld [vmem:[%s2783_s5 + $0x778] sm:$0xff] }
 0x430   :  { %967 = vmatpush.msrb.mxu2 %v1513_v62 }
 0x431   :  { %v2446_v24 = vadd.f32 %v814_v18, %v2253_v28  ;;  %v802_v25 = vmul.f32 %v1641_v6, %v801_v17  ;;  %v1494_v28 = vld [vmem:[%s2783_s5 + $0x4c0] sm:$0xff]  ;;  %v1564_v17 = vld [vmem:[%s2783_s5 + $0x6b0] sm:$0xff] }
 0x432   :  { %883 = vmatpush.msrb.mxu3 %v1494_v28  ;;  %1205 = vmatpush.msra.mxu2 %v1592_v16  ;;  %v1591_v18 = vld [vmem:[%s2783_s5 + $0x770] sm:$0xff] }
 0x433   :  { %832 = vrot.lane.b32.xlu0 %v2446_v24, %s1684_s28  ;;  %v803_v30 = vadd.f32 %v1641_v6, %v802_v25  ;;  %v824_v45 = vrot.slane %v2446_v24, 1  ;;  %v818_v0 = vrot.slane %v2446_v24, 7  ;;  %v1562_v25 = vld [vmem:[%s2783_s5 + $0x6a0] sm:$0xff]  ;;  %v1579_v16 = vld [vmem:[%s2783_s5 + $0x710] sm:$0xff] }
 0x434   :  { %884 = vmatpush.msrb.mxu3 %v1493_v36  ;;  %1206 = vmatpush.msra.mxu2 %v1591_v18 }
 0x435   :  { %v807_v35 = vsel %vm806_vm0, %v1641_v6, %v803_v30 }
 0x436   :  { %v812_v40 = vsel %vm809_vm1, %v811_v34, %v807_v35  ;;  %885 = vmatpush.msrb.mxu3 %v1492_v39  ;;  %1207 = vmatpush.msra.mxu2 %v1590_v23  ;;  %v1551_v23 = vld [vmem:[%s2783_s5 + $0x648] sm:$0xff] }
 0x437   :  { %v815_v38 = vmul.f32 %v812_v40, %v698_v32  ;;  %v1586_v40 = vld [vmem:[%s2783_s5 + $0x748] sm:$0xff] }
 0x438   :  { %886 = vmatpush.msrb.mxu3 %v1491_v43  ;;  %1208 = vmatpush.msra.mxu2 %v1589_v26 }
 0x439   :  { %v2477_v42 = vadd.f32 %v815_v38, %v2284_v47  ;;  %v1490_v47 = vld [vmem:[%s2783_s5 + $0x4a0] sm:$0xff] }
 0x43a   :  { %887 = vmatpush.msrb.mxu3 %v1490_v47  ;;  %1209 = vmatpush.msra.mxu2 %v1588_v29  ;;  %v1558_v38 = vld [vmem:[%s2783_s5 + $0x680] sm:$0xff] }
 0x43b   :  { %834 = vrot.lane.b32.xlu1 %v2477_v42, %s1684_s28  ;;  %v825_v48 = vrot.slane %v2477_v42, 1  ;;  %v819_v63 = vrot.slane %v2477_v42, 7  ;;  %v1613_v47 = vld [vmem:[%s2784_s6 + $0x6] ss:$0 sm:$0xff] }
 0x43c   :  { %888 = vmatpush.msrb.mxu3 %v1489_v52  ;;  %1210 = vmatpush.msra.mxu2 %v1587_v33  ;;  %v1557_v52 = vld [vmem:[%s2783_s5 + $0x678] sm:$0xff] }
 0x43d   :  { %v826_v50 = vsel %vm156_vm3, %v824_v45, %v825_v48  ;;  %v827_v59 = vsel %vm156_vm3, %v825_v48, %v824_v45  ;;  %v821_v1 = vsel %vm145_vm7, %v819_v63, %v818_v0  ;;  %v820_v5 = vsel %vm145_vm7, %v818_v0, %v819_v63  ;;  %1098 = vmatpush.msrb.mxu1 %v1557_v52  ;;  %v1554_v0 = vld [vmem:[%s2783_s5 + $0x660] sm:$0xff]  ;;  %v1549_v33 = vld [vmem:[%s2783_s5 + $0x638] sm:$0xff]  ;;  %v1571_v52 = vld [vmem:[%s2783_s5 + $0x6d0] sm:$0xff] }
 0x43e   :  { %v828_v54 = vsel %vm1890_vm4, 0.0, %v826_v50  ;;  %889 = vmatpush.msrb.mxu3 %v1488_v55  ;;  %v829_v60 = vsel %vm1927_vm6, 0.0, %v827_v59  ;;  %v822_v3 = vsel %vm1946_vm8, 0.0, %v821_v1  ;;  %v823_v8 = vsel %vm1955_vm9, 0.0, %v820_v5  ;;  %1211 = vmatpush.msra.mxu2 %v1586_v40  ;;  %v1581_v1 = vld [vmem:[%s2783_s5 + $0x720] sm:$0xff] }
 0x43f   :  { %1511 = vmatmul.msk.f32.vlgmr.msra.gmra.mxu1 %vm173_vm5, %v828_v54  ;;  %1538 = vmatmul.msk.f32.vlgmr.msra.gmra.mxu0 %vm173_vm5, %v828_v54  ;;  %v1556_v54 = vld [vmem:[%s2783_s5 + $0x670] sm:$0xff] }
 0x440   :  { %890 = vmatpush.msrb.mxu3 %v1487_v53  ;;  %1212 = vmatpush.msra.mxu2 %v1585_v41 }
 0x441   :  { %1099 = vmatpush.msrb.mxu1 %v1556_v54 }
 0x442   :  { %891 = vmatpush.msrb.mxu3 %v1486_v61  ;;  %v1582_v61 = vld [vmem:[%s2783_s5 + $0x728] sm:$0xff] }
 0x443   :  { %1176 = vmatpush.msrb.mxu0 %v1582_v61 }
 0x444   :  { %1129 = vmatpush.msra.mxu3 %v1565_v15  ;;  %v1552_v15 = vld [vmem:[%s2783_s5 + $0x650] sm:$0xff] }
 0x445   :  { %1177 = vmatpush.msrb.mxu0 %v1581_v1 }
 0x446   :  { %1130 = vmatpush.msra.mxu3 %v1564_v17 }
 0x447   :  { %1512 = vmatmul.msk.f32.gmra.mxu1 %vm173_vm5, %v829_v60  ;;  %1539 = vmatmul.msk.f32.gmra.mxu0 %vm173_vm5, %v829_v60  ;;  %v1555_v60 = vld [vmem:[%s2783_s5 + $0x668] sm:$0xff] }
 0x448   :  { %1131 = vmatpush.msra.mxu3 %v1563_v22  ;;  %1100 = vmatpush.msrb.mxu1 %v1555_v60 }
 0x44a   :  { %1132 = vmatpush.msra.mxu3 %v1562_v25  ;;  %1101 = vmatpush.msrb.mxu1 %v1554_v0  ;;  %v1578_v25 = vld [vmem:[%s2783_s5 + $0x708] sm:$0xff] }
 0x44c   :  { %1133 = vmatpush.msra.mxu3 %v1561_v27  ;;  %v1577_v27 = vld [vmem:[%s2783_s5 + $0x700] sm:$0xff] }
 0x44e   :  { %1134 = vmatpush.msra.mxu3 %v1560_v31 }
 0x450   :  { %1135 = vmatpush.msra.mxu3 %v1559_v37  ;;  %v1575_v37 = vld [vmem:[%s2783_s5 + $0x6f0] sm:$0xff] }
 0x452   :  { %1136 = vmatpush.msra.mxu3 %v1558_v38  ;;  %v1547_v38 = vld [vmem:[%s2783_s5 + $0x628] sm:$0xff] }
 0x4a5   :  { %v833_v2 = vpop.permute.xlu0 %832 }
 0x4a6   :  { %v838_v4 = vsel %vm173_vm5, %v822_v3, %v833_v2 }
 0x4a7   :  { %892 = vmatmul.f32.vlgmr.msrb.gmra.mxu3 %v838_v4  ;;  %968 = vmatmul.f32.vlgmr.msrb.gmra.mxu2 %v838_v4 }
 0x4a8   :  { %1288 = vmatpush.msrb.mxu3 %v1269_v14  ;;  %v1304_v14 = vld [vmem:[#allocation2 + $0x8] sm:$0xff] }
 0x4ad   :  { %v835_v6 = vpop.permute.xlu1 %834 }
 0x4ae   :  { %v839_v9 = vsel %vm173_vm5, %v823_v8, %v835_v6 }
 0x4af   :  { %895 = vmatmul.f32.gmra.mxu3 %v839_v9  ;;  %971 = vmatmul.f32.gmra.mxu2 %v839_v9  ;;  %v1553_v9 = vld [vmem:[%s2783_s5 + $0x658] sm:$0xff] }
 0x4b0   :  { %1102 = vmatpush.msrb.mxu1 %v1553_v9 }
 0x4b2   :  { %1103 = vmatpush.msrb.mxu1 %v1552_v15 }
 0x4b4   :  { %1104 = vmatpush.msrb.mxu1 %v1551_v23 }
 0x4bc   :  { %v992_v11 = vpop.f32.mrf.mxu0  ;;  %v916_v62 = vpop.f32.mrf.mxu1 }
 0x4c4   :  { %v995_v34 = vpop.f32.mrf.mxu0  ;;  %v919_v29 = vpop.f32.mrf.mxu1 }
 0x52a   :  { %v969_v12 = vpop.f32.mrf.mxu2  ;;  %v893_v44 = vpop.f32.mrf.mxu3 }
 0x52b   :  { %v970_v13 = vadd.f32 %v1614_v10, %v969_v12  ;;  %v894_v53 = vadd.f32 %v1613_v47, %v893_v44  ;;  %v1573_v44 = vld [vmem:[%s2783_s5 + $0x6e0] sm:$0xff] }
 0x52d   :  { %v993_v20 = vadd.f32 %v992_v11, %v970_v13  ;;  %v917_v4 = vadd.f32 %v916_v62, %v894_v53  ;;  %v1569_v53 = vld [vmem:[%s2783_s5 + $0x6c0] sm:$0xff] }
 0x52f   :  { %v1540_v21 = vmul.f32 -1.442695, %v993_v20 }
 0x531   :  { %1642 = vpow2.f32 %v1540_v21 }
 0x532   :  { %v972_v30 = vpop.f32.mrf.mxu2  ;;  %v896_v5 = vpop.f32.mrf.mxu3 }
 0x533   :  { %v973_v28 = vadd.f32 %v1614_v10, %v972_v30  ;;  %v1580_v10 = vld [vmem:[%s2783_s5 + $0x718] sm:$0xff]  ;;  %v897_v17 = vadd.f32 %v1613_v47, %v896_v5  ;;  %v1616_v5 = vld [vmem:[%s2784_s6 + $0x9] ss:$0 sm:$0xff] }
 0x534   :  { %1178 = vmatpush.msrb.mxu0 %v1580_v10  ;;  %v1572_v47 = vld [vmem:[%s2783_s5 + $0x6d8] sm:$0xff]  ;;  %v1263_v10 = vld [vmem:[%s2785_s7 + $0x8] sm:$0xff] }
 0x535   :  { %v996_v32 = vadd.f32 %v995_v34, %v973_v28  ;;  %v920_v28 = vadd.f32 %v919_v29, %v897_v17  ;;  %v1576_v34 = vld [vmem:[%s2783_s5 + $0x6f8] sm:$0xff] }
 0x536   :  { %1179 = vmatpush.msrb.mxu0 %v1579_v16 }
 0x537   :  { %v1643_v35 = vpop.eup %1642  ;;  %v1541_v36 = vmul.f32 -1.442695, %v996_v32 }
 0x538   :  { %v1004_v39 = vadd.f32 1.0, %v1643_v35  ;;  %1180 = vmatpush.msrb.mxu0 %v1578_v25 }
 0x539   :  { %1644 = vpow2.f32 %v1541_v36  ;;  %v1548_v36 = vld [vmem:[%s2783_s5 + $0x630] sm:$0xff] }
 0x53a   :  { %1646 = vrcp.f32 %v1004_v39  ;;  %v1017_v55 = vand.u32 2147483648, %v1004_v39  ;;  %v1015_v59 = vand.u32 2147483647, %v1004_v39  ;;  %vm1011_vm11 = vweird.f32 %v1004_v39  ;;  %1181 = vmatpush.msrb.mxu0 %v1577_v27 }
 0x53c   :  { %v1018_v3 = vor.u32 1.1754944e-38, %v1017_v55  ;;  %vm1016_vm13 = vcmp.eq.f32.partialorder %v1015_v59, 8.507059e+37  ;;  %1182 = vmatpush.msrb.mxu0 %v1576_v34 }
 0x53e   :  { %1183 = vmatpush.msrb.mxu0 %v1575_v37 }
 0x53f   :  { %v1645_v43 = vpop.eup %1644 }
 0x540   :  { %v1647_v45 = vpop.eup %1646  ;;  %v2594_v48 = vadd.f32 1.0, %v1645_v43 }
 0x541   :  { %v1007_v49 = vmul.f32 %v1647_v45, %v1004_v39  ;;  %vm1012_vm10 = vweird.f32 %v1647_v45  ;;  %v1574_v39 = vld [vmem:[%s2783_s5 + $0x6e8] sm:$0xff] }
 0x542   :  { %1648 = vrcp.f32 %v2594_v48  ;;  %vm1013_vm12 = vmor %vm1011_vm11, %vm1012_vm10  ;;  %v1032_v18 = vand.u32 2147483648, %v2594_v48  ;;  %v1030_v22 = vand.u32 2147483647, %v2594_v48  ;;  %vm1026_vm15 = vweird.f32 %v2594_v48  ;;  %1184 = vmatpush.msrb.mxu0 %v1574_v39 }
 0x543   :  { %v1008_v50 = vsub.f32 1.0, %v1007_v49 }
 0x544   :  { %v1033_v30 = vor.u32 1.1754944e-38, %v1032_v18  ;;  %vm1031_vm1 = vcmp.eq.f32.partialorder %v1030_v22, 8.507059e+37  ;;  %1185 = vmatpush.msrb.mxu0 %v1573_v44 }
 0x545   :  { %v1009_v58 = vmul.f32 %v1647_v45, %v1008_v50  ;;  %v1544_v50 = vld [vmem:[%s2783_s5 + $0x610] sm:$0xff] }
 0x546   :  { %1186 = vmatpush.msrb.mxu0 %v1572_v47 }
 0x547   :  { %v1010_v63 = vadd.f32 %v1647_v45, %v1009_v58 }
 0x548   :  { %v1649_v2 = vpop.eup %1648  ;;  %1187 = vmatpush.msrb.mxu0 %v1571_v52 }
 0x549   :  { %v1022_v6 = vmul.f32 %v1649_v2, %v2594_v48  ;;  %v1014_v8 = vsel %vm1013_vm12, %v1647_v45, %v1010_v63  ;;  %vm1027_vm14 = vweird.f32 %v1649_v2  ;;  %v1545_v48 = vld [vmem:[%s2783_s5 + $0x618] sm:$0xff]  ;;  %vm1317_vm12 = vcmask 261120  }
 0x54a   :  { %v1019_v11 = vsel %vm1016_vm13, %v1018_v3, %v1014_v8  ;;  %vm1028_vm0 = vmor %vm1026_vm15, %vm1027_vm14  ;;  %1188 = vmatpush.msrb.mxu0 %v1570_v51  ;;  %v1268_v3 = vld [vmem:[%s2785_s7 + $0x30] sm:$0xff] }
 0x54b   :  { %v1023_v12 = vsub.f32 1.0, %v1022_v6  ;;  %v1036_v13 = vmul.f32 %v1019_v11, %v917_v4  ;;  %1289 = vmatpush.msrb.mxu3 %v1268_v3  ;;  %v1265_v4 = vld [vmem:[%s2785_s7 + $0x18] sm:$0xff]  ;;  %v1264_v6 = vld [vmem:[%s2785_s7 + $0x10] sm:$0xff] }
 0x54c   :  { %1189 = vmatpush.msrb.mxu0 %v1569_v53 }
 0x54d   :  { %v2639_v20 = vadd.f32 %v1036_v13, %v2446_v24  ;;  %v1024_v21 = vmul.f32 %v1649_v2, %v1023_v12  ;;  %v1550_v24 = vld [vmem:[%s2783_s5 + $0x640] sm:$0xff]  ;;  %1290 = vmatpush.msrb.mxu3 %v1267_v46 }
 0x54e   :  { %1105 = vmatpush.msrb.mxu1 %v1550_v24  ;;  %v1262_v13 = vld [vmem:[%s2785_s7] sm:$0xff] }
 0x54f   :  { %1054 = vrot.lane.b32.xlu2 %v2639_v20, %s1684_s28  ;;  %v1025_v26 = vadd.f32 %v1649_v2, %v1024_v21  ;;  %v1046_v41 = vrot.slane %v2639_v20, 1  ;;  %v1040_v59 = vrot.slane %v2639_v20, 7  ;;  %1291 = vmatpush.msrb.mxu3 %v1266_v19  ;;  %v1615_v21 = vld [vmem:[%s2784_s6 + $0x8] ss:$0 sm:$0xff] }
 0x550   :  { %1106 = vmatpush.msrb.mxu1 %v1549_v33 }
 0x551   :  { %v1029_v31 = vsel %vm1028_vm0, %v1649_v2, %v1025_v26  ;;  %1292 = vmatpush.msrb.mxu3 %v1265_v4 }
 0x552   :  { %v1034_v32 = vsel %vm1031_vm1, %v1033_v30, %v1029_v31  ;;  %1107 = vmatpush.msrb.mxu1 %v1548_v36 }
 0x553   :  { %v1037_v35 = vmul.f32 %v1034_v32, %v920_v28  ;;  %1293 = vmatpush.msrb.mxu3 %v1264_v6 }
 0x554   :  { %1108 = vmatpush.msrb.mxu1 %v1547_v38 }
 0x555   :  { %v2670_v40 = vadd.f32 %v1037_v35, %v2477_v42  ;;  %v1546_v42 = vld [vmem:[%s2783_s5 + $0x620] sm:$0xff]  ;;  %1294 = vmatpush.msrb.mxu3 %v1263_v10 }
 0x556   :  { %1109 = vmatpush.msrb.mxu1 %v1546_v42 }
 0x557   :  { %1056 = vrot.lane.b32.xlu0 %v2670_v40, %s1684_s28  ;;  %v1047_v43 = vrot.slane %v2670_v40, 1  ;;  %v1041_v58 = vrot.slane %v2670_v40, 7  ;;  %1295 = vmatpush.msrb.mxu3 %v1262_v13 }
 0x558   :  { %1110 = vmatpush.msrb.mxu1 %v1545_v48 }
 0x559   :  { %v1048_v45 = vsel %vm156_vm3, %v1046_v41, %v1047_v43  ;;  %v1049_v54 = vsel %vm156_vm3, %v1047_v43, %v1046_v41  ;;  %v1043_v7 = vsel %vm145_vm7, %v1041_v58, %v1040_v59  ;;  %v1042_v63 = vsel %vm145_vm7, %v1040_v59, %v1041_v58 }
 0x55a   :  { %v1050_v49 = vsel %vm1890_vm4, 0.0, %v1048_v45  ;;  %1111 = vmatpush.msrb.mxu1 %v1544_v50  ;;  %v1051_v55 = vsel %vm1927_vm6, 0.0, %v1049_v54  ;;  %v1044_v61 = vsel %vm1946_vm8, 0.0, %v1043_v7  ;;  %v1045_v1 = vsel %vm1955_vm9, 0.0, %v1042_v63  ;;  %v1303_v63 = vld [vmem:[#allocation2] sm:$0xff] }
 0x55b   :  { %1567 = vmatmul.msk.f32.vlgmr.msra.gmra.mxu3 %vm173_vm5, %v1050_v49  ;;  %1594 = vmatmul.msk.f32.vlgmr.msra.gmra.mxu2 %vm173_vm5, %v1050_v49 }
 0x55c   :  { %1112 = vmatpush.msrb.mxu1 %v1543_v56 }
 0x55e   :  { %1113 = vmatpush.msrb.mxu1 %v1542_v57 }
 0x563   :  { %1568 = vmatmul.msk.f32.gmra.mxu3 %vm173_vm5, %v1051_v55  ;;  %1595 = vmatmul.msk.f32.gmra.mxu2 %vm173_vm5, %v1051_v55 }
 0x5a9   :  { %v1055_v60 = vpop.permute.xlu2 %1054 }
 0x5aa   :  { %v1060_v62 = vsel %vm173_vm5, %v1044_v61, %v1055_v60  ;;  %v1617_v60 = vld [vmem:[%s2786_s8] ss:$0 sm:$0xff] }
 0x5ab   :  { %1114 = vmatmul.f32.vlgmr.msrb.gmra.mxu1 %v1060_v62  ;;  %1190 = vmatmul.f32.vlgmr.msrb.gmra.mxu0 %v1060_v62 }
 0x5c9   :  { %v1057_v0 = vpop.permute.xlu0 %1056 }
 0x5ca   :  { %v1061_v2 = vsel %vm173_vm5, %v1045_v1, %v1057_v0 }
 0x5cb   :  { %1117 = vmatmul.f32.gmra.mxu1 %v1061_v2  ;;  %1193 = vmatmul.f32.gmra.mxu0 %v1061_v2 }
 0x5de   :  { %v1214_v11 = vpop.f32.mrf.mxu2  ;;  %v1138_v28 = vpop.f32.mrf.mxu3 }
 0x5e6   :  { %v1217_v38 = vpop.f32.mrf.mxu2  ;;  %v1141_v55 = vpop.f32.mrf.mxu3 }
 0x628   :  { %v1191_v8 = vpop.f32.mrf.mxu0  ;;  %v1115_v23 = vpop.f32.mrf.mxu1 }
 0x629   :  { %v1192_v9 = vadd.f32 %v1616_v5, %v1191_v8  ;;  %v1116_v24 = vadd.f32 %v1615_v21, %v1115_v23 }
 0x62b   :  { %v1215_v12 = vadd.f32 %v1214_v11, %v1192_v9  ;;  %v1139_v33 = vadd.f32 %v1138_v28, %v1116_v24 }
 0x62d   :  { %v1596_v15 = vmul.f32 -1.442695, %v1215_v12 }
 0x62f   :  { %1650 = vpow2.f32 %v1596_v15 }
 0x635   :  { %v1651_v16 = vpop.eup %1650 }
 0x636   :  { %v1226_v17 = vadd.f32 1.0, %v1651_v16 }
 0x638   :  { %1652 = vrcp.f32 %v1226_v17  ;;  %v1239_v26 = vand.u32 2147483648, %v1226_v17  ;;  %v1237_v29 = vand.u32 2147483647, %v1226_v17  ;;  %vm1233_vm4 = vweird.f32 %v1226_v17 }
 0x63a   :  { %v1240_v31 = vor.u32 1.1754944e-38, %v1239_v26  ;;  %vm1238_vm7 = vcmp.eq.f32.partialorder %v1237_v29, 8.507059e+37 }
 0x63e   :  { %v1653_v18 = vpop.eup %1652 }
 0x63f   :  { %v1229_v22 = vmul.f32 %v1653_v18, %v1226_v17  ;;  %vm1234_vm3 = vweird.f32 %v1653_v18 }
 0x640   :  { %vm1235_vm6 = vmor %vm1233_vm4, %vm1234_vm3 }
 0x641   :  { %v1230_v25 = vsub.f32 1.0, %v1229_v22 }
 0x643   :  { %v1231_v27 = vmul.f32 %v1653_v18, %v1230_v25 }
 0x645   :  { %v1232_v30 = vadd.f32 %v1653_v18, %v1231_v27 }
 0x647   :  { %v1236_v34 = vsel %vm1235_vm6, %v1653_v18, %v1232_v30 }
 0x648   :  { %v1194_v32 = vpop.f32.mrf.mxu0  ;;  %v1241_v35 = vsel %vm1238_vm7, %v1240_v31, %v1236_v34  ;;  %v1118_v47 = vpop.f32.mrf.mxu1 }
 0x649   :  { %v1195_v36 = vadd.f32 %v1616_v5, %v1194_v32  ;;  %v1258_v37 = vmul.f32 %v1241_v35, %v1139_v33  ;;  %v1119_v52 = vadd.f32 %v1615_v21, %v1118_v47 }
 0x64b   :  { %v1218_v39 = vadd.f32 %v1217_v38, %v1195_v36  ;;  %v1260_v41 = vadd.f32 %v1258_v37, %v2639_v20  ;;  %v1142_v57 = vadd.f32 %v1141_v55, %v1119_v52 }
 0x64d   :  { %v1597_v43 = vmul.f32 -1.442695, %v1218_v39  ;;  %1598 = vmatmul.msk.f32.vlgmr.msrb.gmra.mxu3 %vm173_vm5, %v1260_v41 }
 0x64f   :  { %1654 = vpow2.f32 %v1597_v43 }
 0x655   :  { %v1655_v42 = vpop.eup %1654 }
 0x656   :  { %v1227_v44 = vadd.f32 1.0, %v1655_v42 }
 0x658   :  { %1656 = vrcp.f32 %v1227_v44  ;;  %v1254_v50 = vand.u32 2147483648, %v1227_v44  ;;  %v1252_v51 = vand.u32 2147483647, %v1227_v44  ;;  %vm1248_vm9 = vweird.f32 %v1227_v44 }
 0x65a   :  { %v1255_v20 = vor.u32 1.1754944e-38, %v1254_v50  ;;  %vm1253_vm11 = vcmp.eq.f32.partialorder %v1252_v51, 8.507059e+37 }
 0x65e   :  { %v1657_v45 = vpop.eup %1656 }
 0x65f   :  { %v1244_v48 = vmul.f32 %v1657_v45, %v1227_v44  ;;  %vm1249_vm8 = vweird.f32 %v1657_v45 }
 0x660   :  { %vm1250_vm10 = vmor %vm1248_vm9, %vm1249_vm8 }
 0x661   :  { %v1245_v49 = vsub.f32 1.0, %v1244_v48 }
 0x663   :  { %v1246_v56 = vmul.f32 %v1657_v45, %v1245_v49 }
 0x665   :  { %v1247_v54 = vadd.f32 %v1657_v45, %v1246_v56 }
 0x667   :  { %v1251_v53 = vsel %vm1250_vm10, %v1657_v45, %v1247_v54 }
 0x668   :  { %v1256_v58 = vsel %vm1253_vm11, %v1255_v20, %v1251_v53 }
 0x669   :  { %v1259_v59 = vmul.f32 %v1256_v58, %v1142_v57 }
 0x66b   :  { %v1261_v7 = vadd.f32 %v1259_v59, %v2670_v40 }
 0x66d   :  { %1599 = vmatmul.msk.f32.gmra.mxu3 %vm173_vm5, %v1261_v7 }
 0x6d0   :  { %v1297_v61 = vpop.f32.mrf.mxu3 }
 0x6d1   :  { %v1298_v62 = vadd.f32 %v1617_v60, %v1297_v61 }
 0x6d3   :  { %v1305_v0 = vadd.f32 %v1303_v63, %v1298_v62 }
 0x6d5   :  { %1309 = vrot.lane.b32.xlu1 %v1305_v0, %s1685_s11 }
 0x6f0   :  { %v1300_v1 = vpop.f32.mrf.mxu3 }
 0x6f1   :  { %v1301_v2 = vadd.f32 %v1617_v60, %v1300_v1 }
 0x6f3   :  { %v1306_v3 = vadd.f32 %v1304_v14, %v1301_v2 }
 0x6f5   :  { %1311 = vrot.lane.b32.xlu2 %v1306_v3, %s1685_s11 }
 0x747   :  { %v1310_v46 = vpop.permute.xlu1 %1309 }
 0x748   :  { %v1315_v40 = vsel %vm74_vm2, %v1298_v62, %v1310_v46 }
 0x749   :  { %1318 = vst.msk [vmem:[#allocation3] sm:$0xff] %vm1317_vm12, %v1315_v40 }
 0x74f   :  { %v1312_v19 = vpop.permute.xlu2 %1311 }
 0x750   :  { %v1316_v4 = vsel %vm74_vm2, %v1301_v2, %v1312_v19 }
 0x751   :  { %1319 = vst.msk [vmem:[#allocation3 + $0x8] sm:$0xff] %vm1317_vm12, %v1316_v4 }
 0x752   :  { %1332 = dma.vmem_to_hbm [thread:$0]  %s1325_s13, 256, %s1327_s15, [#allocation4], %s1687_s16, %s1687_s16, %s1688_s1  }
 0x753   :  { %1682 = dma.done.wait [#allocation4], 256  }
 0x754   :  { %1683 = vsyncadd [#allocation4], 4294967040 }
 0x755   :  { %1337 = vsyncpa [#allocation4], 1 }

</bundles_post_ra>
